<compile_context>
chip_gen: v7x
topology: tpu7x:2x2x1
jax: 0.10.0
libtpu: 0.0.40
codegen_flags: <defaults>
</compile_context>

<pallas_src>
import functools
import math

import jax
import jax.numpy as jnp
from jax.experimental import pallas as pl
from jax.experimental.pallas import tpu as pltpu


# ----------------------------- Pallas kernel -------------------------------


def _layernorm(x, w, b, eps=1e-5):
    mean = jnp.mean(x, axis=-1, keepdims=True)
    var = jnp.mean(jnp.square(x - mean), axis=-1, keepdims=True)
    return (x - mean) * jax.lax.rsqrt(var + eps) * w + b


def fused_encoder_kernel(
    x_hbm_ref,                                  # (B, T, D) bf16, HBM (x + PE)
    wqkv_ref, bqkv_ref, wo_ref, bo_ref,
    ln1w_ref, ln1b_ref, w1_ref, b1_ref, w2_ref, b2_ref,
    ln2w_ref, ln2b_ref,
    o_ref,                                      # (bt, T, D) f32 output tile
    x_scr, copy_sem,                            # resident activations + DMA sem
    *, nhead,
):
    """grid = (batch_tile, layer). One step = one encoder layer on one batch
    tile; activations carried across the layer axis in bf16 VMEM scratch."""
    bidx = pl.program_id(0)
    l = pl.program_id(1)
    n_layers = pl.num_programs(1)
    bt, T, D = x_scr.shape
    Dh = D // nhead
    M = bt * T
    bf16, f32 = jnp.bfloat16, jnp.float32

    # Layer 0 of this batch tile: pull (x + PE) rows straight from HBM into the
    # resident scratch (no per-layer BlockSpec pipelining of x).
    @pl.when(l == 0)
    def _():
        start = pl.multiple_of(bidx * bt, bt) if bt > 1 else bidx
        cp = pltpu.make_async_copy(x_hbm_ref.at[pl.ds(start, bt)], x_scr, copy_sem)
        cp.start()
        cp.wait()

    x_bf = x_scr[...].reshape(M, D)             # bf16 resident activations
    x_f32 = x_bf.astype(f32)

    # ---------------- multi-head self-attention ----------------
    # One K=D QKV matmul for the whole tile.
    qkv = jnp.dot(x_bf, wqkv_ref[...], preferred_element_type=f32) + bqkv_ref[...]
    scale = 1.0 / math.sqrt(Dh)
    q = (qkv[:, :D] * scale).reshape(bt, T, D)  # PyTorch scales q before QK^T
    k = qkv[:, D:2 * D].reshape(bt, T, D)
    v = qkv[:, 2 * D:].reshape(bt, T, D)

    head_outs = []
    for h in range(nhead):                      # small static head loop
        sl = slice(h * Dh, (h + 1) * Dh)
        qh = q[:, :, sl].astype(bf16)
        kh = k[:, :, sl].astype(bf16)
        vh = v[:, :, sl].astype(bf16)
        s = jnp.einsum('bqd,bkd->bqk', qh, kh, preferred_element_type=f32)
        s = s - jnp.max(s, axis=-1, keepdims=True)
        p = jnp.exp(s)
        p = p / jnp.sum(p, axis=-1, keepdims=True)       # exact softmax (parity)
        head_outs.append(jnp.einsum('bqk,bkd->bqd', p.astype(bf16), vh,
                                    preferred_element_type=f32))
    # Lane-axis concat of head outputs, then ONE K=D output projection.
    attn_in = jnp.concatenate(head_outs, axis=-1).reshape(M, D).astype(bf16)
    attn = jnp.dot(attn_in, wo_ref[...], preferred_element_type=f32) + bo_ref[...]

    # residual + LayerNorm 1 (post-norm, f32 stats)
    y = _layernorm(x_f32 + attn, ln1w_ref[...], ln1b_ref[...])
    y_bf = y.astype(bf16)

    # ---------------- feed-forward, chunked over dff ----------------
    # h1 chunk -> ReLU -> matmul against matching w2 chunk -> accumulate, so the
    # (M, 4D) intermediate never fully lives.
    n_chunks = w1_ref.shape[0]

    def ffn_chunk(c, acc):
        h1 = jnp.dot(y_bf, w1_ref[c], preferred_element_type=f32) + b1_ref[c]
        h1 = jnp.maximum(h1, 0.0)
        return acc + jnp.dot(h1.astype(bf16), w2_ref[c], preferred_element_type=f32)

    ff0 = jnp.zeros((M, D), f32) + b2_ref[...]
    ff = jax.lax.fori_loop(0, n_chunks, ffn_chunk, ff0, unroll=(n_chunks <= 8))

    # residual + LayerNorm 2
    out = _layernorm(y + ff, ln2w_ref[...], ln2b_ref[...])

    # Carry activations (bf16) for the next layer; skip on the last layer.
    @pl.when(l < n_layers - 1)
    def _():
        x_scr[...] = out.astype(bf16).reshape(bt, T, D)

    # Only the last layer materializes the HBM output tile (f32).
    @pl.when(l == n_layers - 1)
    def _():
        o_ref[...] = out.reshape(bt, T, D)


# ----------------------------- wrapper --------------------------------------


def build_sinusoidal_pe(seq_len, d_model):
    # matches SinusoidalPositionalEncoding
    positions = jnp.arange(seq_len, dtype=jnp.float32)[:, None]          # (T, 1)
    i_vals = jnp.arange(d_model // 2, dtype=jnp.float32)                 # (D/2,)
    freqs = 10000.0 ** (-2.0 * i_vals / d_model)
    pe_sin = jnp.sin(positions * freqs)                                  # (T, D/2)
    pe_cos = jnp.cos(positions * freqs)
    pe = jnp.stack([pe_sin, pe_cos], axis=-1).reshape(seq_len, d_model)  # interleave
    return pe


def init_stacked_params(key, layers, d_model, dff):
    """Per-layer params stacked on a leading L axis; weights pre-transposed to
    (in_features, out_features) and stored in bf16 (MXU operands)."""
    f32, bf16 = jnp.float32, jnp.bfloat16
    std = 0.02
    k = jax.random.split(key, 4)
    wqkv_t = (jax.random.normal(k[0], (layers, d_model, 3 * d_model)) * std).astype(bf16)
    wo_t = (jax.random.normal(k[1], (layers, d_model, d_model)) * std).astype(bf16)
    w1_t = (jax.random.normal(k[2], (layers, d_model, dff)) * std).astype(bf16)
    w2_t = (jax.random.normal(k[3], (layers, dff, d_model)) * std).astype(bf16)
    bqkv = jnp.zeros((layers, 1, 3 * d_model), f32)
    bo = jnp.zeros((layers, 1, d_model), f32)
    ln1w = jnp.ones((layers, 1, d_model), f32)
    ln1b = jnp.zeros((layers, 1, d_model), f32)
    b1 = jnp.zeros((layers, 1, dff), f32)
    b2 = jnp.zeros((layers, 1, d_model), f32)
    ln2w = jnp.ones((layers, 1, d_model), f32)
    ln2b = jnp.zeros((layers, 1, d_model), f32)
    return (wqkv_t, bqkv, wo_t, bo, ln1w, ln1b,
            w1_t, b1, w2_t, b2, ln2w, ln2b)


def rnn_encoder_forward(x_bct, params, nhead, *, b_tile=1, dff_chunk=None):
    """x_bct: [B, C, T] with C == d_model. Returns ([B, C, T], hidden_outputs=[])."""
    B, C, T = x_bct.shape
    D = C
    wqkv, bqkv, wo, bo, ln1w, ln1b, w1, b1, w2, b2, ln2w, ln2b = params
    L = wqkv.shape[0]
    dff = w1.shape[2]
    if dff_chunk is None:
        dff_chunk = min(dff, 512)

    assert D % nhead == 0
    assert D % 128 == 0, "pad d_model to a multiple of 128 (lane-dense layout)"
    assert T % 8 == 0, "pad T to a multiple of 8 (sublane-dense layout)"
    assert B % b_tile == 0
    assert dff % dff_chunk == 0 and dff_chunk % 128 == 0

    # ---- glue: transpose, add PE (dropout == identity in eval), cast once ----
    x_btd = jnp.transpose(x_bct, (0, 2, 1)).astype(jnp.float32)    # [B, T, D]
    pe = build_sinusoidal_pe(T, D)
    x_in = (x_btd + pe[None]).astype(jnp.bfloat16)                 # fed via pl.ANY

    # ---- pre-chunk the FFN weights on a leading chunk axis ----
    n_chunks = dff // dff_chunk
    w1c = w1.reshape(L, D, n_chunks, dff_chunk).transpose(0, 2, 1, 3)   # (L,nc,D,ck)
    b1c = b1.reshape(L, 1, n_chunks, dff_chunk).transpose(0, 2, 1, 3)   # (L,nc,1,ck)
    w2c = w2.reshape(L, n_chunks, dff_chunk, D)                         # (L,nc,ck,D)

    kernel_params = (wqkv, bqkv, wo, bo, ln1w, ln1b, w1c, b1c, w2c, b2, ln2w, ln2b)

    n_btiles = B // b_tile
    grid = (n_btiles, L)

    def layer_spec(a):
        nd = a.ndim
        # leading L axis squeezed; block index advances with the layer axis only
        return pl.BlockSpec((None,) + a.shape[1:],
                            lambda bi, li, _nd=nd: (li,) + (0,) * (_nd - 1))

    in_specs = [pl.BlockSpec(memory_space=pl.ANY)] + [layer_spec(a) for a in kernel_params]

    # ---- VMEM budget: double-buffered weight stream + working set, capped ----
    per_layer_w_bytes = sum(int(math.prod(p.shape[1:])) * p.dtype.itemsize
                            for p in kernel_params)
    rows = b_tile * T
    working_bytes = (rows * D * 4 * 8            # f32 temporaries (qkv/attn/y/ff/out)
                     + rows * dff_chunk * 4      # one FFN chunk intermediate
                     + b_tile * T * T * 4 * 3    # one head's score/prob buffers
                     + rows * D * 2 * 2)         # bf16 activation copies
    scratch_bytes = rows * D * 2                 # resident bf16 activations
    out_block_bytes = 2 * rows * D * 4           # double-buffered output tile
    est = (2 * per_layer_w_bytes + working_bytes + scratch_bytes
           + out_block_bytes + (2 << 20))
    vmem_limit = int(min(max(est, 32 * 1024 * 1024), 56 * 1024 * 1024))

    out = pl.pallas_call(
        functools.partial(fused_encoder_kernel, nhead=nhead),
        grid=grid,
        in_specs=in_specs,
        out_specs=pl.BlockSpec((b_tile, T, D), lambda bi, li: (bi, 0, 0)),
        out_shape=jax.ShapeDtypeStruct((B, T, D), jnp.float32),
        scratch_shapes=[
            pltpu.VMEM((b_tile, T, D), jnp.bfloat16),   # resident activations
            pltpu.SemaphoreType.DMA(()),                # layer-0 input DMA
        ],
        compiler_params=pltpu.CompilerParams(
            # batch tiles are independent (v7x dual-TC); the layer axis carries
            # state in VMEM scratch -> "arbitrary".
            dimension_semantics=("parallel", "arbitrary"),
            vmem_limit_bytes=vmem_limit,
        ),
    )(x_in, *kernel_params)

    out_bct = jnp.transpose(out, (0, 2, 1))             # back to [B, C, T]
    return out_bct, []                                  # return_hidden_outputs=False


# ----------------------------- main ------------------------------------------

if __name__ == "__main__":
    d_model = 128          # lane-aligned (multiple of 128), nhead*Dh == d_model
    nhead = 4
    layers = 2
    B, T = 2, 16
    dff = 4 * d_model

    root = jax.random.PRNGKey(0)
    kx, kp = jax.random.split(root)
    x = jax.random.normal(kx, (B, d_model, T), dtype=jnp.float32)   # [B, C, T]

    params = init_stacked_params(kp, layers, d_model, dff)

    out, hidden = rnn_encoder_forward(x, params, nhead, b_tile=1, dff_chunk=256)
    out = jax.block_until_ready(out)
    assert out.shape == (B, d_model, T)
    assert hidden == []
    assert bool(jnp.all(jnp.isfinite(out)))
    print("KERNEL_OK")
</pallas_src>

<mosaic_0001>
module attributes {stable_mosaic.version = 11 : i64} {
  func.func @fused_encoder_kernel(%arg0: i32, %arg1: i32, %arg2: memref<2x16x128xbf16, #tpu.memory_space<any>>, %arg3: memref<1x128x384xbf16, #tpu.memory_space<vmem>>, %arg4: memref<1x1x384xf32, #tpu.memory_space<vmem>>, %arg5: memref<1x128x128xbf16, #tpu.memory_space<vmem>>, %arg6: memref<1x1x128xf32, #tpu.memory_space<vmem>>, %arg7: memref<1x1x128xf32, #tpu.memory_space<vmem>>, %arg8: memref<1x1x128xf32, #tpu.memory_space<vmem>>, %arg9: memref<1x2x128x256xbf16, #tpu.memory_space<vmem>>, %arg10: memref<1x2x1x256xf32, #tpu.memory_space<vmem>>, %arg11: memref<1x2x256x128xbf16, #tpu.memory_space<vmem>>, %arg12: memref<1x1x128xf32, #tpu.memory_space<vmem>>, %arg13: memref<1x1x128xf32, #tpu.memory_space<vmem>>, %arg14: memref<1x1x128xf32, #tpu.memory_space<vmem>>, %arg15: memref<1x16x128xf32, #tpu.memory_space<vmem>>, %arg16: memref<1x16x128xbf16, #tpu.memory_space<vmem>>, %arg17: memref<!tpu.dma_semaphore, #tpu.memory_space<semaphore_mem>>) attributes {dimension_semantics = [#tpu.dimension_semantics<parallel>, #tpu.dimension_semantics<arbitrary>], iteration_bounds = array<i64: 2, 2>, scalar_prefetch = 0 : i64, scratch_operands = 2 : i64, tpu.core_type = #tpu.core_type<tc>, window_params = [{}, {transform_indices = @transform_1, window_bounds = array<i64: 1, 128, 384>}, {transform_indices = @transform_2, window_bounds = array<i64: 1, 1, 384>}, {transform_indices = @transform_3, window_bounds = array<i64: 1, 128, 128>}, {transform_indices = @transform_4, window_bounds = array<i64: 1, 1, 128>}, {transform_indices = @transform_5, window_bounds = array<i64: 1, 1, 128>}, {transform_indices = @transform_6, window_bounds = array<i64: 1, 1, 128>}, {transform_indices = @transform_7, window_bounds = array<i64: 1, 2, 128, 256>}, {transform_indices = @transform_8, window_bounds = array<i64: 1, 2, 1, 256>}, {transform_indices = @transform_9, window_bounds = array<i64: 1, 2, 256, 128>}, {transform_indices = @transform_10, window_bounds = array<i64: 1, 1, 128>}, {transform_indices = @transform_11, window_bounds = array<i64: 1, 1, 128>}, {transform_indices = @transform_12, window_bounds = array<i64: 1, 1, 128>}, {transform_indices = @transform_13, window_bounds = array<i64: 1, 16, 128>}]} {
    %c0_i32 = arith.constant 0 : i32
    %0 = arith.cmpi eq, %arg1, %c0_i32 : i32
    %1 = arith.extui %0 : i1 to i32
    %c0_i32_0 = arith.constant 0 : i32
    %2 = arith.cmpi ne, %1, %c0_i32_0 : i32
    scf.if %2 {
      %c0_i32_88 = arith.constant 0 : i32
      %c0_i32_89 = arith.constant 0 : i32
      %203 = tpu.memref_slice %arg2[%arg0, %c0_i32_88, %c0_i32_89] : memref<2x16x128xbf16, #tpu.memory_space<any>> -> memref<1x16x128xbf16, #tpu.memory_space<any>>
      tpu.enqueue_dma source(%203 : memref<1x16x128xbf16, #tpu.memory_space<any>>) target(%arg16 : memref<1x16x128xbf16, #tpu.memory_space<vmem>>) target_semaphore(%arg17 : memref<!tpu.dma_semaphore, #tpu.memory_space<semaphore_mem>>)
      %c0_i32_90 = arith.constant 0 : i32
      %c0_i32_91 = arith.constant 0 : i32
      %204 = tpu.memref_slice %arg2[%arg0, %c0_i32_90, %c0_i32_91] : memref<2x16x128xbf16, #tpu.memory_space<any>> -> memref<1x16x128xbf16, #tpu.memory_space<any>>
      tpu.wait_dma2 semaphore(%arg17 : memref<!tpu.dma_semaphore, #tpu.memory_space<semaphore_mem>>) src(%204 : memref<1x16x128xbf16, #tpu.memory_space<any>>) dst(%arg16 : memref<1x16x128xbf16, #tpu.memory_space<vmem>>)
    } else {
    }
    %c0 = arith.constant 0 : index
    %c0_1 = arith.constant 0 : index
    %c0_2 = arith.constant 0 : index
    %3 = vector.load %arg16[%c0, %c0_1, %c0_2] : memref<1x16x128xbf16, #tpu.memory_space<vmem>>, vector<1x16x128xbf16>
    %4 = vector.shape_cast %3 : vector<1x16x128xbf16> to vector<16x128xbf16>
    %5 = arith.extf %4 : vector<16x128xbf16> to vector<16x128xf32>
    %c0_3 = arith.constant 0 : index
    %c0_4 = arith.constant 0 : index
    %c0_5 = arith.constant 0 : index
    %6 = vector.load %arg3[%c0_3, %c0_4, %c0_5] : memref<1x128x384xbf16, #tpu.memory_space<vmem>>, vector<1x128x384xbf16>
    %7 = vector.shape_cast %6 : vector<1x128x384xbf16> to vector<128x384xbf16>
    %cst = arith.constant dense<0.000000e+00> : vector<16x384xf32>
    %8 = tpu.matmul %4, %7, %cst {dimension_numbers = #tpu.dot_dimension_numbers<[1], [0], [0], [1], [0, 0, 1, 1], [], []>} : vector<16x128xbf16>, vector<128x384xbf16>, vector<16x384xf32> -> vector<16x384xf32>
    %c0_6 = arith.constant 0 : index
    %c0_7 = arith.constant 0 : index
    %c0_8 = arith.constant 0 : index
    %9 = vector.load %arg4[%c0_6, %c0_7, %c0_8] : memref<1x1x384xf32, #tpu.memory_space<vmem>>, vector<1x1x384xf32>
    %10 = vector.shape_cast %9 : vector<1x1x384xf32> to vector<1x384xf32>
    %11 = vector.broadcast %10 : vector<1x384xf32> to vector<16x384xf32>
    %12 = arith.addf %8, %11 : vector<16x384xf32>
    %13 = vector.extract_strided_slice %12 {offsets = [0, 0], sizes = [16, 128], strides = [1, 1]} : vector<16x384xf32> to vector<16x128xf32>
    %cst_9 = arith.constant 0.176776692 : f32
    %14 = vector.broadcast %cst_9 : f32 to vector<16x128xf32>
    %15 = arith.mulf %13, %14 : vector<16x128xf32>
    %16 = vector.shape_cast %15 : vector<16x128xf32> to vector<1x16x128xf32>
    %17 = vector.extract_strided_slice %12 {offsets = [0, 128], sizes = [16, 128], strides = [1, 1]} : vector<16x384xf32> to vector<16x128xf32>
    %18 = vector.shape_cast %17 : vector<16x128xf32> to vector<1x16x128xf32>
    %19 = vector.extract_strided_slice %12 {offsets = [0, 256], sizes = [16, 128], strides = [1, 1]} : vector<16x384xf32> to vector<16x128xf32>
    %20 = vector.shape_cast %19 : vector<16x128xf32> to vector<1x16x128xf32>
    %21 = vector.extract_strided_slice %16 {offsets = [0, 0, 0], sizes = [1, 16, 32], strides = [1, 1, 1]} : vector<1x16x128xf32> to vector<1x16x32xf32>
    %22 = arith.truncf %21 : vector<1x16x32xf32> to vector<1x16x32xbf16>
    %23 = vector.extract_strided_slice %18 {offsets = [0, 0, 0], sizes = [1, 16, 32], strides = [1, 1, 1]} : vector<1x16x128xf32> to vector<1x16x32xf32>
    %24 = arith.truncf %23 : vector<1x16x32xf32> to vector<1x16x32xbf16>
    %25 = vector.extract_strided_slice %20 {offsets = [0, 0, 0], sizes = [1, 16, 32], strides = [1, 1, 1]} : vector<1x16x128xf32> to vector<1x16x32xf32>
    %26 = arith.truncf %25 : vector<1x16x32xf32> to vector<1x16x32xbf16>
    "tpu.trace_start"() <{level = 10 : i32, message = "bqd,bkd->bqk"}> : () -> ()
    %cst_10 = arith.constant dense<0.000000e+00> : vector<1x16x16xf32>
    %27 = tpu.matmul %22, %24, %cst_10 {dimension_numbers = #tpu.dot_dimension_numbers<[2], [2], [1], [1], [0, 0, 0, 1, 1, 1], [0], [0]>} : vector<1x16x32xbf16>, vector<1x16x32xbf16>, vector<1x16x16xf32> -> vector<1x16x16xf32>
    "tpu.trace_stop"() : () -> ()
    %cst_11 = arith.constant dense<0xFF800000> : vector<1x16xf32>
    %28 = vector.multi_reduction <maximumf>, %27, %cst_11 [2] : vector<1x16x16xf32> to vector<1x16xf32>
    %29 = vector.shape_cast %28 : vector<1x16xf32> to vector<1x16x1xf32>
    %30 = vector.broadcast %29 : vector<1x16x1xf32> to vector<1x16x16xf32>
    %31 = arith.subf %27, %30 : vector<1x16x16xf32>
    %32 = math.exp %31 : vector<1x16x16xf32>
    %cst_12 = arith.constant dense<0.000000e+00> : vector<1x16xf32>
    %33 = vector.multi_reduction <add>, %32, %cst_12 [2] : vector<1x16x16xf32> to vector<1x16xf32>
    %34 = vector.shape_cast %33 : vector<1x16xf32> to vector<1x16x1xf32>
    %35 = vector.broadcast %34 : vector<1x16x1xf32> to vector<1x16x16xf32>
    %36 = arith.divf %32, %35 : vector<1x16x16xf32>
    %37 = arith.truncf %36 : vector<1x16x16xf32> to vector<1x16x16xbf16>
    "tpu.trace_start"() <{level = 10 : i32, message = "bqk,bkd->bqd"}> : () -> ()
    %cst_13 = arith.constant dense<0.000000e+00> : vector<1x16x32xf32>
    %38 = tpu.matmul %37, %26, %cst_13 {dimension_numbers = #tpu.dot_dimension_numbers<[2], [1], [1], [2], [0, 0, 0, 1, 1, 2], [0], [0]>} : vector<1x16x16xbf16>, vector<1x16x32xbf16>, vector<1x16x32xf32> -> vector<1x16x32xf32>
    "tpu.trace_stop"() : () -> ()
    %39 = vector.extract_strided_slice %16 {offsets = [0, 0, 32], sizes = [1, 16, 32], strides = [1, 1, 1]} : vector<1x16x128xf32> to vector<1x16x32xf32>
    %40 = arith.truncf %39 : vector<1x16x32xf32> to vector<1x16x32xbf16>
    %41 = vector.extract_strided_slice %18 {offsets = [0, 0, 32], sizes = [1, 16, 32], strides = [1, 1, 1]} : vector<1x16x128xf32> to vector<1x16x32xf32>
    %42 = arith.truncf %41 : vector<1x16x32xf32> to vector<1x16x32xbf16>
    %43 = vector.extract_strided_slice %20 {offsets = [0, 0, 32], sizes = [1, 16, 32], strides = [1, 1, 1]} : vector<1x16x128xf32> to vector<1x16x32xf32>
    %44 = arith.truncf %43 : vector<1x16x32xf32> to vector<1x16x32xbf16>
    "tpu.trace_start"() <{level = 10 : i32, message = "bqd,bkd->bqk"}> : () -> ()
    %cst_14 = arith.constant dense<0.000000e+00> : vector<1x16x16xf32>
    %45 = tpu.matmul %40, %42, %cst_14 {dimension_numbers = #tpu.dot_dimension_numbers<[2], [2], [1], [1], [0, 0, 0, 1, 1, 1], [0], [0]>} : vector<1x16x32xbf16>, vector<1x16x32xbf16>, vector<1x16x16xf32> -> vector<1x16x16xf32>
    "tpu.trace_stop"() : () -> ()
    %cst_15 = arith.constant dense<0xFF800000> : vector<1x16xf32>
    %46 = vector.multi_reduction <maximumf>, %45, %cst_15 [2] : vector<1x16x16xf32> to vector<1x16xf32>
    %47 = vector.shape_cast %46 : vector<1x16xf32> to vector<1x16x1xf32>
    %48 = vector.broadcast %47 : vector<1x16x1xf32> to vector<1x16x16xf32>
    %49 = arith.subf %45, %48 : vector<1x16x16xf32>
    %50 = math.exp %49 : vector<1x16x16xf32>
    %cst_16 = arith.constant dense<0.000000e+00> : vector<1x16xf32>
    %51 = vector.multi_reduction <add>, %50, %cst_16 [2] : vector<1x16x16xf32> to vector<1x16xf32>
    %52 = vector.shape_cast %51 : vector<1x16xf32> to vector<1x16x1xf32>
    %53 = vector.broadcast %52 : vector<1x16x1xf32> to vector<1x16x16xf32>
    %54 = arith.divf %50, %53 : vector<1x16x16xf32>
    %55 = arith.truncf %54 : vector<1x16x16xf32> to vector<1x16x16xbf16>
    "tpu.trace_start"() <{level = 10 : i32, message = "bqk,bkd->bqd"}> : () -> ()
    %cst_17 = arith.constant dense<0.000000e+00> : vector<1x16x32xf32>
    %56 = tpu.matmul %55, %44, %cst_17 {dimension_numbers = #tpu.dot_dimension_numbers<[2], [1], [1], [2], [0, 0, 0, 1, 1, 2], [0], [0]>} : vector<1x16x16xbf16>, vector<1x16x32xbf16>, vector<1x16x32xf32> -> vector<1x16x32xf32>
    "tpu.trace_stop"() : () -> ()
    %57 = vector.extract_strided_slice %16 {offsets = [0, 0, 64], sizes = [1, 16, 32], strides = [1, 1, 1]} : vector<1x16x128xf32> to vector<1x16x32xf32>
    %58 = arith.truncf %57 : vector<1x16x32xf32> to vector<1x16x32xbf16>
    %59 = vector.extract_strided_slice %18 {offsets = [0, 0, 64], sizes = [1, 16, 32], strides = [1, 1, 1]} : vector<1x16x128xf32> to vector<1x16x32xf32>
    %60 = arith.truncf %59 : vector<1x16x32xf32> to vector<1x16x32xbf16>
    %61 = vector.extract_strided_slice %20 {offsets = [0, 0, 64], sizes = [1, 16, 32], strides = [1, 1, 1]} : vector<1x16x128xf32> to vector<1x16x32xf32>
    %62 = arith.truncf %61 : vector<1x16x32xf32> to vector<1x16x32xbf16>
    "tpu.trace_start"() <{level = 10 : i32, message = "bqd,bkd->bqk"}> : () -> ()
    %cst_18 = arith.constant dense<0.000000e+00> : vector<1x16x16xf32>
    %63 = tpu.matmul %58, %60, %cst_18 {dimension_numbers = #tpu.dot_dimension_numbers<[2], [2], [1], [1], [0, 0, 0, 1, 1, 1], [0], [0]>} : vector<1x16x32xbf16>, vector<1x16x32xbf16>, vector<1x16x16xf32> -> vector<1x16x16xf32>
    "tpu.trace_stop"() : () -> ()
    %cst_19 = arith.constant dense<0xFF800000> : vector<1x16xf32>
    %64 = vector.multi_reduction <maximumf>, %63, %cst_19 [2] : vector<1x16x16xf32> to vector<1x16xf32>
    %65 = vector.shape_cast %64 : vector<1x16xf32> to vector<1x16x1xf32>
    %66 = vector.broadcast %65 : vector<1x16x1xf32> to vector<1x16x16xf32>
    %67 = arith.subf %63, %66 : vector<1x16x16xf32>
    %68 = math.exp %67 : vector<1x16x16xf32>
    %cst_20 = arith.constant dense<0.000000e+00> : vector<1x16xf32>
    %69 = vector.multi_reduction <add>, %68, %cst_20 [2] : vector<1x16x16xf32> to vector<1x16xf32>
    %70 = vector.shape_cast %69 : vector<1x16xf32> to vector<1x16x1xf32>
    %71 = vector.broadcast %70 : vector<1x16x1xf32> to vector<1x16x16xf32>
    %72 = arith.divf %68, %71 : vector<1x16x16xf32>
    %73 = arith.truncf %72 : vector<1x16x16xf32> to vector<1x16x16xbf16>
    "tpu.trace_start"() <{level = 10 : i32, message = "bqk,bkd->bqd"}> : () -> ()
    %cst_21 = arith.constant dense<0.000000e+00> : vector<1x16x32xf32>
    %74 = tpu.matmul %73, %62, %cst_21 {dimension_numbers = #tpu.dot_dimension_numbers<[2], [1], [1], [2], [0, 0, 0, 1, 1, 2], [0], [0]>} : vector<1x16x16xbf16>, vector<1x16x32xbf16>, vector<1x16x32xf32> -> vector<1x16x32xf32>
    "tpu.trace_stop"() : () -> ()
    %75 = vector.extract_strided_slice %16 {offsets = [0, 0, 96], sizes = [1, 16, 32], strides = [1, 1, 1]} : vector<1x16x128xf32> to vector<1x16x32xf32>
    %76 = arith.truncf %75 : vector<1x16x32xf32> to vector<1x16x32xbf16>
    %77 = vector.extract_strided_slice %18 {offsets = [0, 0, 96], sizes = [1, 16, 32], strides = [1, 1, 1]} : vector<1x16x128xf32> to vector<1x16x32xf32>
    %78 = arith.truncf %77 : vector<1x16x32xf32> to vector<1x16x32xbf16>
    %79 = vector.extract_strided_slice %20 {offsets = [0, 0, 96], sizes = [1, 16, 32], strides = [1, 1, 1]} : vector<1x16x128xf32> to vector<1x16x32xf32>
    %80 = arith.truncf %79 : vector<1x16x32xf32> to vector<1x16x32xbf16>
    "tpu.trace_start"() <{level = 10 : i32, message = "bqd,bkd->bqk"}> : () -> ()
    %cst_22 = arith.constant dense<0.000000e+00> : vector<1x16x16xf32>
    %81 = tpu.matmul %76, %78, %cst_22 {dimension_numbers = #tpu.dot_dimension_numbers<[2], [2], [1], [1], [0, 0, 0, 1, 1, 1], [0], [0]>} : vector<1x16x32xbf16>, vector<1x16x32xbf16>, vector<1x16x16xf32> -> vector<1x16x16xf32>
    "tpu.trace_stop"() : () -> ()
    %cst_23 = arith.constant dense<0xFF800000> : vector<1x16xf32>
    %82 = vector.multi_reduction <maximumf>, %81, %cst_23 [2] : vector<1x16x16xf32> to vector<1x16xf32>
    %83 = vector.shape_cast %82 : vector<1x16xf32> to vector<1x16x1xf32>
    %84 = vector.broadcast %83 : vector<1x16x1xf32> to vector<1x16x16xf32>
    %85 = arith.subf %81, %84 : vector<1x16x16xf32>
    %86 = math.exp %85 : vector<1x16x16xf32>
    %cst_24 = arith.constant dense<0.000000e+00> : vector<1x16xf32>
    %87 = vector.multi_reduction <add>, %86, %cst_24 [2] : vector<1x16x16xf32> to vector<1x16xf32>
    %88 = vector.shape_cast %87 : vector<1x16xf32> to vector<1x16x1xf32>
    %89 = vector.broadcast %88 : vector<1x16x1xf32> to vector<1x16x16xf32>
    %90 = arith.divf %86, %89 : vector<1x16x16xf32>
    %91 = arith.truncf %90 : vector<1x16x16xf32> to vector<1x16x16xbf16>
    "tpu.trace_start"() <{level = 10 : i32, message = "bqk,bkd->bqd"}> : () -> ()
    %cst_25 = arith.constant dense<0.000000e+00> : vector<1x16x32xf32>
    %92 = tpu.matmul %91, %80, %cst_25 {dimension_numbers = #tpu.dot_dimension_numbers<[2], [1], [1], [2], [0, 0, 0, 1, 1, 2], [0], [0]>} : vector<1x16x16xbf16>, vector<1x16x32xbf16>, vector<1x16x32xf32> -> vector<1x16x32xf32>
    "tpu.trace_stop"() : () -> ()
    %93 = tpu.concatenate %38, %56, %74, %92 in 2 : vector<1x16x32xf32>, vector<1x16x32xf32>, vector<1x16x32xf32>, vector<1x16x32xf32> -> vector<1x16x128xf32>
    %94 = vector.shape_cast %93 : vector<1x16x128xf32> to vector<16x128xf32>
    %95 = arith.truncf %94 : vector<16x128xf32> to vector<16x128xbf16>
    %c0_26 = arith.constant 0 : index
    %c0_27 = arith.constant 0 : index
    %c0_28 = arith.constant 0 : index
    %96 = vector.load %arg5[%c0_26, %c0_27, %c0_28] : memref<1x128x128xbf16, #tpu.memory_space<vmem>>, vector<1x128x128xbf16>
    %97 = vector.shape_cast %96 : vector<1x128x128xbf16> to vector<128x128xbf16>
    %cst_29 = arith.constant dense<0.000000e+00> : vector<16x128xf32>
    %98 = tpu.matmul %95, %97, %cst_29 {dimension_numbers = #tpu.dot_dimension_numbers<[1], [0], [0], [1], [0, 0, 1, 1], [], []>} : vector<16x128xbf16>, vector<128x128xbf16>, vector<16x128xf32> -> vector<16x128xf32>
    %c0_30 = arith.constant 0 : index
    %c0_31 = arith.constant 0 : index
    %c0_32 = arith.constant 0 : index
    %99 = vector.load %arg6[%c0_30, %c0_31, %c0_32] : memref<1x1x128xf32, #tpu.memory_space<vmem>>, vector<1x1x128xf32>
    %100 = vector.shape_cast %99 : vector<1x1x128xf32> to vector<1x128xf32>
    %101 = vector.broadcast %100 : vector<1x128xf32> to vector<16x128xf32>
    %102 = arith.addf %98, %101 : vector<16x128xf32>
    %103 = arith.addf %5, %102 : vector<16x128xf32>
    %c0_33 = arith.constant 0 : index
    %c0_34 = arith.constant 0 : index
    %c0_35 = arith.constant 0 : index
    %104 = vector.load %arg7[%c0_33, %c0_34, %c0_35] : memref<1x1x128xf32, #tpu.memory_space<vmem>>, vector<1x1x128xf32>
    %105 = vector.shape_cast %104 : vector<1x1x128xf32> to vector<1x128xf32>
    %c0_36 = arith.constant 0 : index
    %c0_37 = arith.constant 0 : index
    %c0_38 = arith.constant 0 : index
    %106 = vector.load %arg8[%c0_36, %c0_37, %c0_38] : memref<1x1x128xf32, #tpu.memory_space<vmem>>, vector<1x1x128xf32>
    %107 = vector.shape_cast %106 : vector<1x1x128xf32> to vector<1x128xf32>
    %cst_39 = arith.constant dense<0.000000e+00> : vector<16xf32>
    %108 = vector.multi_reduction <add>, %103, %cst_39 [1] : vector<16x128xf32> to vector<16xf32>
    %109 = vector.shape_cast %108 : vector<16xf32> to vector<16x1xf32>
    %cst_40 = arith.constant 1.280000e+02 : f32
    %110 = vector.broadcast %cst_40 : f32 to vector<16x1xf32>
    %111 = arith.divf %109, %110 : vector<16x1xf32>
    %112 = vector.broadcast %111 : vector<16x1xf32> to vector<16x128xf32>
    %113 = arith.subf %103, %112 : vector<16x128xf32>
    %114 = arith.mulf %113, %113 : vector<16x128xf32>
    %cst_41 = arith.constant dense<0.000000e+00> : vector<16xf32>
    %115 = vector.multi_reduction <add>, %114, %cst_41 [1] : vector<16x128xf32> to vector<16xf32>
    %116 = vector.shape_cast %115 : vector<16xf32> to vector<16x1xf32>
    %cst_42 = arith.constant 1.280000e+02 : f32
    %117 = vector.broadcast %cst_42 : f32 to vector<16x1xf32>
    %118 = arith.divf %116, %117 : vector<16x1xf32>
    %119 = vector.broadcast %111 : vector<16x1xf32> to vector<16x128xf32>
    %120 = arith.subf %103, %119 : vector<16x128xf32>
    %cst_43 = arith.constant 9.99999974E-6 : f32
    %121 = vector.broadcast %cst_43 : f32 to vector<16x1xf32>
    %122 = arith.addf %118, %121 : vector<16x1xf32>
    %123 = math.rsqrt %122 : vector<16x1xf32>
    %124 = vector.broadcast %123 : vector<16x1xf32> to vector<16x128xf32>
    %125 = arith.mulf %120, %124 : vector<16x128xf32>
    %126 = vector.broadcast %105 : vector<1x128xf32> to vector<16x128xf32>
    %127 = arith.mulf %125, %126 : vector<16x128xf32>
    %128 = vector.broadcast %107 : vector<1x128xf32> to vector<16x128xf32>
    %129 = arith.addf %127, %128 : vector<16x128xf32>
    %130 = arith.truncf %129 : vector<16x128xf32> to vector<16x128xbf16>
    %cst_44 = arith.constant 0.000000e+00 : f32
    %131 = vector.broadcast %cst_44 : f32 to vector<16x128xf32>
    %c0_45 = arith.constant 0 : index
    %c0_46 = arith.constant 0 : index
    %c0_47 = arith.constant 0 : index
    %132 = vector.load %arg12[%c0_45, %c0_46, %c0_47] : memref<1x1x128xf32, #tpu.memory_space<vmem>>, vector<1x1x128xf32>
    %133 = vector.shape_cast %132 : vector<1x1x128xf32> to vector<1x128xf32>
    %134 = vector.broadcast %133 : vector<1x128xf32> to vector<16x128xf32>
    %135 = arith.addf %131, %134 : vector<16x128xf32>
    %c0_i32_48 = arith.constant 0 : i32
    %c0_49 = arith.constant 0 : index
    %136 = arith.index_cast %c0_i32_48 : i32 to index
    %c0_50 = arith.constant 0 : index
    %c0_51 = arith.constant 0 : index
    %137 = vector.load %arg9[%c0_49, %136, %c0_50, %c0_51] : memref<1x2x128x256xbf16, #tpu.memory_space<vmem>>, vector<1x1x128x256xbf16>
    %138 = vector.shape_cast %137 : vector<1x1x128x256xbf16> to vector<128x256xbf16>
    %cst_52 = arith.constant dense<0.000000e+00> : vector<16x256xf32>
    %139 = tpu.matmul %130, %138, %cst_52 {dimension_numbers = #tpu.dot_dimension_numbers<[1], [0], [0], [1], [0, 0, 1, 1], [], []>} : vector<16x128xbf16>, vector<128x256xbf16>, vector<16x256xf32> -> vector<16x256xf32>
    %c0_53 = arith.constant 0 : index
    %140 = arith.index_cast %c0_i32_48 : i32 to index
    %c0_54 = arith.constant 0 : index
    %c0_55 = arith.constant 0 : index
    %141 = vector.load %arg10[%c0_53, %140, %c0_54, %c0_55] : memref<1x2x1x256xf32, #tpu.memory_space<vmem>>, vector<1x1x1x256xf32>
    %142 = vector.shape_cast %141 : vector<1x1x1x256xf32> to vector<1x256xf32>
    %143 = vector.broadcast %142 : vector<1x256xf32> to vector<16x256xf32>
    %144 = arith.addf %139, %143 : vector<16x256xf32>
    %cst_56 = arith.constant 0.000000e+00 : f32
    %145 = vector.broadcast %cst_56 : f32 to vector<16x256xf32>
    %146 = arith.maximumf %144, %145 : vector<16x256xf32>
    %147 = arith.truncf %146 : vector<16x256xf32> to vector<16x256xbf16>
    %c0_57 = arith.constant 0 : index
    %148 = arith.index_cast %c0_i32_48 : i32 to index
    %c0_58 = arith.constant 0 : index
    %c0_59 = arith.constant 0 : index
    %149 = vector.load %arg11[%c0_57, %148, %c0_58, %c0_59] : memref<1x2x256x128xbf16, #tpu.memory_space<vmem>>, vector<1x1x256x128xbf16>
    %150 = vector.shape_cast %149 : vector<1x1x256x128xbf16> to vector<256x128xbf16>
    %cst_60 = arith.constant dense<0.000000e+00> : vector<16x128xf32>
    %151 = tpu.matmul %147, %150, %cst_60 {dimension_numbers = #tpu.dot_dimension_numbers<[1], [0], [0], [1], [0, 0, 1, 1], [], []>} : vector<16x256xbf16>, vector<256x128xbf16>, vector<16x128xf32> -> vector<16x128xf32>
    %152 = arith.addf %135, %151 : vector<16x128xf32>
    %c1_i32 = arith.constant 1 : i32
    %c0_61 = arith.constant 0 : index
    %153 = arith.index_cast %c1_i32 : i32 to index
    %c0_62 = arith.constant 0 : index
    %c0_63 = arith.constant 0 : index
    %154 = vector.load %arg9[%c0_61, %153, %c0_62, %c0_63] : memref<1x2x128x256xbf16, #tpu.memory_space<vmem>>, vector<1x1x128x256xbf16>
    %155 = vector.shape_cast %154 : vector<1x1x128x256xbf16> to vector<128x256xbf16>
    %cst_64 = arith.constant dense<0.000000e+00> : vector<16x256xf32>
    %156 = tpu.matmul %130, %155, %cst_64 {dimension_numbers = #tpu.dot_dimension_numbers<[1], [0], [0], [1], [0, 0, 1, 1], [], []>} : vector<16x128xbf16>, vector<128x256xbf16>, vector<16x256xf32> -> vector<16x256xf32>
    %c0_65 = arith.constant 0 : index
    %157 = arith.index_cast %c1_i32 : i32 to index
    %c0_66 = arith.constant 0 : index
    %c0_67 = arith.constant 0 : index
    %158 = vector.load %arg10[%c0_65, %157, %c0_66, %c0_67] : memref<1x2x1x256xf32, #tpu.memory_space<vmem>>, vector<1x1x1x256xf32>
    %159 = vector.shape_cast %158 : vector<1x1x1x256xf32> to vector<1x256xf32>
    %160 = vector.broadcast %159 : vector<1x256xf32> to vector<16x256xf32>
    %161 = arith.addf %156, %160 : vector<16x256xf32>
    %cst_68 = arith.constant 0.000000e+00 : f32
    %162 = vector.broadcast %cst_68 : f32 to vector<16x256xf32>
    %163 = arith.maximumf %161, %162 : vector<16x256xf32>
    %164 = arith.truncf %163 : vector<16x256xf32> to vector<16x256xbf16>
    %c0_69 = arith.constant 0 : index
    %165 = arith.index_cast %c1_i32 : i32 to index
    %c0_70 = arith.constant 0 : index
    %c0_71 = arith.constant 0 : index
    %166 = vector.load %arg11[%c0_69, %165, %c0_70, %c0_71] : memref<1x2x256x128xbf16, #tpu.memory_space<vmem>>, vector<1x1x256x128xbf16>
    %167 = vector.shape_cast %166 : vector<1x1x256x128xbf16> to vector<256x128xbf16>
    %cst_72 = arith.constant dense<0.000000e+00> : vector<16x128xf32>
    %168 = tpu.matmul %164, %167, %cst_72 {dimension_numbers = #tpu.dot_dimension_numbers<[1], [0], [0], [1], [0, 0, 1, 1], [], []>} : vector<16x256xbf16>, vector<256x128xbf16>, vector<16x128xf32> -> vector<16x128xf32>
    %169 = arith.addf %152, %168 : vector<16x128xf32>
    %c2_i32 = arith.constant 2 : i32
    %170 = arith.addf %129, %169 : vector<16x128xf32>
    %c0_73 = arith.constant 0 : index
    %c0_74 = arith.constant 0 : index
    %c0_75 = arith.constant 0 : index
    %171 = vector.load %arg13[%c0_73, %c0_74, %c0_75] : memref<1x1x128xf32, #tpu.memory_space<vmem>>, vector<1x1x128xf32>
    %172 = vector.shape_cast %171 : vector<1x1x128xf32> to vector<1x128xf32>
    %c0_76 = arith.constant 0 : index
    %c0_77 = arith.constant 0 : index
    %c0_78 = arith.constant 0 : index
    %173 = vector.load %arg14[%c0_76, %c0_77, %c0_78] : memref<1x1x128xf32, #tpu.memory_space<vmem>>, vector<1x1x128xf32>
    %174 = vector.shape_cast %173 : vector<1x1x128xf32> to vector<1x128xf32>
    %cst_79 = arith.constant dense<0.000000e+00> : vector<16xf32>
    %175 = vector.multi_reduction <add>, %170, %cst_79 [1] : vector<16x128xf32> to vector<16xf32>
    %176 = vector.shape_cast %175 : vector<16xf32> to vector<16x1xf32>
    %cst_80 = arith.constant 1.280000e+02 : f32
    %177 = vector.broadcast %cst_80 : f32 to vector<16x1xf32>
    %178 = arith.divf %176, %177 : vector<16x1xf32>
    %179 = vector.broadcast %178 : vector<16x1xf32> to vector<16x128xf32>
    %180 = arith.subf %170, %179 : vector<16x128xf32>
    %181 = arith.mulf %180, %180 : vector<16x128xf32>
    %cst_81 = arith.constant dense<0.000000e+00> : vector<16xf32>
    %182 = vector.multi_reduction <add>, %181, %cst_81 [1] : vector<16x128xf32> to vector<16xf32>
    %183 = vector.shape_cast %182 : vector<16xf32> to vector<16x1xf32>
    %cst_82 = arith.constant 1.280000e+02 : f32
    %184 = vector.broadcast %cst_82 : f32 to vector<16x1xf32>
    %185 = arith.divf %183, %184 : vector<16x1xf32>
    %186 = vector.broadcast %178 : vector<16x1xf32> to vector<16x128xf32>
    %187 = arith.subf %170, %186 : vector<16x128xf32>
    %cst_83 = arith.constant 9.99999974E-6 : f32
    %188 = vector.broadcast %cst_83 : f32 to vector<16x1xf32>
    %189 = arith.addf %185, %188 : vector<16x1xf32>
    %190 = math.rsqrt %189 : vector<16x1xf32>
    %191 = vector.broadcast %190 : vector<16x1xf32> to vector<16x128xf32>
    %192 = arith.mulf %187, %191 : vector<16x128xf32>
    %193 = vector.broadcast %172 : vector<1x128xf32> to vector<16x128xf32>
    %194 = arith.mulf %192, %193 : vector<16x128xf32>
    %195 = vector.broadcast %174 : vector<1x128xf32> to vector<16x128xf32>
    %196 = arith.addf %194, %195 : vector<16x128xf32>
    %c1_i32_84 = arith.constant 1 : i32
    %197 = arith.cmpi slt, %arg1, %c1_i32_84 : i32
    %198 = arith.extui %197 : i1 to i32
    %c0_i32_85 = arith.constant 0 : i32
    %199 = arith.cmpi ne, %198, %c0_i32_85 : i32
    scf.if %199 {
      %203 = arith.truncf %196 : vector<16x128xf32> to vector<16x128xbf16>
      %204 = vector.shape_cast %203 : vector<16x128xbf16> to vector<1x16x128xbf16>
      %c0_88 = arith.constant 0 : index
      %c0_89 = arith.constant 0 : index
      %c0_90 = arith.constant 0 : index
      %205 = vector.load %arg16[%c0_88, %c0_89, %c0_90] : memref<1x16x128xbf16, #tpu.memory_space<vmem>>, vector<1x16x128xbf16>
      tpu.vector_store %arg16[%c0_88, %c0_89, %c0_90], %204 {strides = array<i32>} : memref<1x16x128xbf16, #tpu.memory_space<vmem>>, vector<1x16x128xbf16>,
    } else {
    }
    %c1_i32_86 = arith.constant 1 : i32
    %200 = arith.cmpi eq, %arg1, %c1_i32_86 : i32
    %201 = arith.extui %200 : i1 to i32
    %c0_i32_87 = arith.constant 0 : i32
    %202 = arith.cmpi ne, %201, %c0_i32_87 : i32
    scf.if %202 {
      %203 = vector.shape_cast %196 : vector<16x128xf32> to vector<1x16x128xf32>
      %c0_88 = arith.constant 0 : index
      %c0_89 = arith.constant 0 : index
      %c0_90 = arith.constant 0 : index
      %204 = vector.load %arg15[%c0_88, %c0_89, %c0_90] : memref<1x16x128xf32, #tpu.memory_space<vmem>>, vector<1x16x128xf32>
      tpu.vector_store %arg15[%c0_88, %c0_89, %c0_90], %203 {strides = array<i32>} : memref<1x16x128xf32, #tpu.memory_space<vmem>>, vector<1x16x128xf32>,
    } else {
    }
    return
  }
  func.func @transform_1(%arg0: i32, %arg1: i32) -> (i32, i32, i32) {
    %c0_i32 = arith.constant 0 : i32
    %c0_i32_0 = arith.constant 0 : i32
    %c0_i32_1 = arith.constant 0 : i32
    return %arg1, %c0_i32, %c0_i32_0 : i32, i32, i32
  }
  func.func @transform_2(%arg0: i32, %arg1: i32) -> (i32, i32, i32) {
    %c0_i32 = arith.constant 0 : i32
    %c0_i32_0 = arith.constant 0 : i32
    %c0_i32_1 = arith.constant 0 : i32
    return %arg1, %c0_i32, %c0_i32_0 : i32, i32, i32
  }
  func.func @transform_3(%arg0: i32, %arg1: i32) -> (i32, i32, i32) {
    %c0_i32 = arith.constant 0 : i32
    %c0_i32_0 = arith.constant 0 : i32
    %c0_i32_1 = arith.constant 0 : i32
    return %arg1, %c0_i32, %c0_i32_0 : i32, i32, i32
  }
  func.func @transform_4(%arg0: i32, %arg1: i32) -> (i32, i32, i32) {
    %c0_i32 = arith.constant 0 : i32
    %c0_i32_0 = arith.constant 0 : i32
    %c0_i32_1 = arith.constant 0 : i32
    return %arg1, %c0_i32, %c0_i32_0 : i32, i32, i32
  }
  func.func @transform_5(%arg0: i32, %arg1: i32) -> (i32, i32, i32) {
    %c0_i32 = arith.constant 0 : i32
    %c0_i32_0 = arith.constant 0 : i32
    %c0_i32_1 = arith.constant 0 : i32
    return %arg1, %c0_i32, %c0_i32_0 : i32, i32, i32
  }
  func.func @transform_6(%arg0: i32, %arg1: i32) -> (i32, i32, i32) {
    %c0_i32 = arith.constant 0 : i32
    %c0_i32_0 = arith.constant 0 : i32
    %c0_i32_1 = arith.constant 0 : i32
    return %arg1, %c0_i32, %c0_i32_0 : i32, i32, i32
  }
  func.func @transform_7(%arg0: i32, %arg1: i32) -> (i32, i32, i32, i32) {
    %c0_i32 = arith.constant 0 : i32
    %c0_i32_0 = arith.constant 0 : i32
    %c0_i32_1 = arith.constant 0 : i32
    %c0_i32_2 = arith.constant 0 : i32
    return %arg1, %c0_i32, %c0_i32_0, %c0_i32_1 : i32, i32, i32, i32
  }
  func.func @transform_8(%arg0: i32, %arg1: i32) -> (i32, i32, i32, i32) {
    %c0_i32 = arith.constant 0 : i32
    %c0_i32_0 = arith.constant 0 : i32
    %c0_i32_1 = arith.constant 0 : i32
    %c0_i32_2 = arith.constant 0 : i32
    return %arg1, %c0_i32, %c0_i32_0, %c0_i32_1 : i32, i32, i32, i32
  }
  func.func @transform_9(%arg0: i32, %arg1: i32) -> (i32, i32, i32, i32) {
    %c0_i32 = arith.constant 0 : i32
    %c0_i32_0 = arith.constant 0 : i32
    %c0_i32_1 = arith.constant 0 : i32
    %c0_i32_2 = arith.constant 0 : i32
    return %arg1, %c0_i32, %c0_i32_0, %c0_i32_1 : i32, i32, i32, i32
  }
  func.func @transform_10(%arg0: i32, %arg1: i32) -> (i32, i32, i32) {
    %c0_i32 = arith.constant 0 : i32
    %c0_i32_0 = arith.constant 0 : i32
    %c0_i32_1 = arith.constant 0 : i32
    return %arg1, %c0_i32, %c0_i32_0 : i32, i32, i32
  }
  func.func @transform_11(%arg0: i32, %arg1: i32) -> (i32, i32, i32) {
    %c0_i32 = arith.constant 0 : i32
    %c0_i32_0 = arith.constant 0 : i32
    %c0_i32_1 = arith.constant 0 : i32
    return %arg1, %c0_i32, %c0_i32_0 : i32, i32, i32
  }
  func.func @transform_12(%arg0: i32, %arg1: i32) -> (i32, i32, i32) {
    %c0_i32 = arith.constant 0 : i32
    %c0_i32_0 = arith.constant 0 : i32
    %c0_i32_1 = arith.constant 0 : i32
    return %arg1, %c0_i32, %c0_i32_0 : i32, i32, i32
  }
  func.func @transform_13(%arg0: i32, %arg1: i32) -> (i32, i32, i32) {
    %c0_i32 = arith.constant 0 : i32
    %c0_i32_0 = arith.constant 0 : i32
    %c0_i32_1 = arith.constant 0 : i32
    return %arg0, %c0_i32, %c0_i32_0 : i32, i32, i32
  }
}

</mosaic_0001>

<bundles_post_ra>
// kernel: tpu_custom_call.1
= control target key start
LH: loop header
LB: loop body
LE: loop exit
PB: predicated region body
PF: predicated region fallthrough
CT: control target
= control target key end

     0   :  { %s4464_s0 = inlined_call_operand.hbm [shape: bf16[2,16,128], index: 0, kind: input, shape index: {}]   ;;  %s4465_s1 = inlined_call_operand.hbm [shape: bf16[2,128,384], index: 1, kind: input, shape index: {}]   ;;  %s4466_s2 = inlined_call_operand.vmem [shape: f32[2,1,384], index: 2, kind: input, shape index: {}]   ;;  %s4467_s3 = inlined_call_operand.hbm [shape: bf16[2,128,128], index: 3, kind: input, shape index: {}]   ;;  %s4468_s4 = inlined_call_operand.hbm [shape: f32[2,1,128], index: 4, kind: input, shape index: {}]   ;;  %s4469_s5 = inlined_call_operand.vmem [shape: f32[2,1,128], index: 5, kind: input, shape index: {}]   ;;  %s4470_s6 = inlined_call_operand.vmem [shape: f32[2,1,128], index: 6, kind: input, shape index: {}]   ;;  %s4471_s7 = inlined_call_operand.hbm [shape: bf16[2,2,128,256], index: 7, kind: input, shape index: {}]   ;;  %s4472_s8 = inlined_call_operand.vmem [shape: f32[2,2,1,256], index: 8, kind: input, shape index: {}]   ;;  %s4473_s9 = inlined_call_operand.hbm [shape: bf16[2,2,256,128], index: 9, kind: input, shape index: {}]   ;;  %s4474_s10 = inlined_call_operand.vmem [shape: f32[2,1,128], index: 10, kind: input, shape index: {}]   ;;  %s4475_s11 = inlined_call_operand.vmem [shape: f32[2,1,128], index: 11, kind: input, shape index: {}]   ;;  %s4476_s12 = inlined_call_operand.vmem [shape: f32[2,1,128], index: 12, kind: input, shape index: {}]   ;;  %s4477_s13 = inlined_call_operand.hbm [shape: f32[2,16,128], index: 13, kind: output, shape index: {}]  }
   0x1   :  { %4510 = sst [smem:[#allocation39_spill]] %s4464_s0 }
   0x2   :  { %4511 = sst [smem:[#allocation40_spill]] %s4465_s1 }
   0x3   :  { %4512 = sst [smem:[#allocation41_spill]] %s4466_s2 }
   0x4   :  { %4513 = sst [smem:[#allocation42_spill]] %s4467_s3 }
   0x5   :  { %4514 = sst [smem:[#allocation43_spill]] %s4468_s4 }
   0x6   :  { %4515 = sst [smem:[#allocation44_spill]] %s4469_s5 }
   0x7   :  { %4516 = sst [smem:[#allocation45_spill]] %s4470_s6 }
   0x8   :  { %4517 = sst [smem:[#allocation46_spill]] %s4471_s7 }
   0x9   :  { %4518 = sst [smem:[#allocation47_spill]] %s4472_s8 }
   0xa   :  { %4519 = sst [smem:[#allocation48_spill]] %s4473_s9 }
   0xb   :  { %4520 = sst [smem:[#allocation49_spill]] %s4474_s10 }
   0xc   :  { %4521 = sst [smem:[#allocation50_spill]] %s4475_s11 }
   0xd   :  { %4522 = sst [smem:[#allocation51_spill]] %s4476_s12 }
   0xe   :  { %4523 = sst [smem:[#allocation52_spill]] %s4477_s13 }
   0xf   :  { %18 = vsyncpa [#allocation5], 0 }
  0x10   :  { %20 = vsyncpa [#allocation5 + $0x1], 0 }
  0x11   :  { %21 = vsyncpa [#allocation8], 0 }
  0x12   :  { %23 = vsyncpa [#allocation8 + $0x1], 0 }
  0x13   :  { %24 = vsyncpa [#allocation11], 0 }
  0x14   :  { %26 = vsyncpa [#allocation11 + $0x1], 0 }
  0x15   :  { %27 = vsyncpa [#allocation6], 0 }
  0x16   :  { %29 = vsyncpa [#allocation6 + $0x1], 0  ;;  %s3727_s25 = smov 0   ;;  %s3729_s26 = smov 0  }
  0x17   :  { %s3731_s27 = smov 0   ;;  %s3733_s28 = smov 0  }
  0x18   :  { %s3735_s29 = smov 0   ;;  %s3737_s30 = smov 0  }
  0x19   :  { %s3739_s14 = smov 0   ;;  %s3741_s15 = smov 0  }
  0x1a   :  { %s3743_s16 = smov 0   ;;  %s3745_s17 = smov 0  }
  0x1b   :  { %s3747_s18 = smov 0  }
  0x1c LB: > { %4524 = sst [smem:[#allocation23_spill]] %s3594_s25  ;;  %s3781_s19 = sadd.s32 4294967295, %s3634_s18   ;;  %s3634_s18 = sphi %s3747_s18, %s35_s18   ;;  %s3630_s17 = sphi %s3745_s17, %s4597_s17   ;;  %s3626_s16 = sphi %s3743_s16, %s4596_s16   ;;  %s3622_s15 = sphi %s3741_s15, %s4595_s15   ;;  %s3618_s14 = sphi %s3739_s14, %s4594_s14   ;;  %s3614_s30 = sphi %s3737_s30, %s4593_s30   ;;  %s3610_s29 = sphi %s3735_s29, %s4592_s29   ;;  %s3606_s28 = sphi %s3733_s28, %s4591_s28   ;;  %s3602_s27 = sphi %s3731_s27, %s4590_s27   ;;  %s3598_s26 = sphi %s3729_s26, %s4589_s26   ;;  %s3594_s25 = sphi %s3727_s25, %s4588_s25  }
  0x1d   : > { %4525 = sst [smem:[#allocation24_spill]] %s3598_s26  ;;  %s2641_s20 = sadd.s32 4294967294, %s3634_s18  }
  0x1e   : > { %4526 = sst [smem:[#allocation25_spill]] %s3602_s27  ;;  %s44_s21 = sadd.s32 1, %s3626_s16 }
  0x1f   : > { %4527 = sst [smem:[#allocation26_spill]] %s3610_s29  ;;  %s47_s22 = sadd.s32 1, %s3630_s17 }
  0x20   : > { %4528 = sst [smem:[#allocation27_spill]] %s3614_s30  ;;  %p45_p0 = scmp.ge.s32.totalorder %s44_s21, 2 }
  0x21   : > { %4529 = sst [smem:[#allocation28_spill]] %s3622_s15  ;;  %s54_s23 = sadd.s32 1, %s3614_s30 }
  0x22   : > { %4530 = sst [smem:[#allocation29_spill]] %s3626_s16  ;;  %p61_p1 = scmp.ne.s32.totalorder %s3614_s30, %s3610_s29 }
  0x23   : > { %4531 = sst [smem:[#allocation30_spill]] %s3630_s17  ;;  %p62_p2 = scmp.eq.s32.totalorder %s3634_s18, 0 }
  0x24   : > { %4532 = sst [smem:[#allocation31_spill]] %s3634_s18  ;;  %s4599_s21 = smov (%p45_p0, %s44_s21), 0 }
  0x25   : > { %4533 = sst [smem:[#allocation32_spill]] %s4599_s21  ;;  %s4601_s22 = smov (!%p45_p0, %s47_s22), %s3630_s17 }
  0x26   : > { %s51_s24 = ssub.s32 %s3626_s16, %s4599_s21  ;;  %p3795_p3 = por %p62_p2, %p61_p1 }
  0x27   : > { %p49_p4 = scmp.ge.s32.totalorder %s4601_s22, 2  ;;  %p52_p5 = scmp.eq.s32.totalorder %s51_s24, 0 }
  0x28   : > { %p67_p6 = scmp.ne.s32.totalorder %s3610_s29, %s3606_s28  ;;  %p68_p7 = scmp.eq.s32.totalorder %s3781_s19, 0 }
  0x29   : > { %s4603_s22 = smov (%p49_p4, %s4601_s22), 0  ;;  %s366_s11 = sadd.s32 1, %s3602_s27 }
  0x2a   : > { %4535 = sst [smem:[#allocation33_spill]] %s4603_s22  ;;  %p3806_p8 = por %p68_p7, %p67_p6 }
  0x2b   : > { %s3804_s0 = scalar_select %p52_p5, %s3614_s30, %s54_s23  }
  0x2c   : > { %s4537_s21 = scalar_select %p3806_p8, 1, 0 }
  0x2d   : > { %4536 = sst [smem:[#allocation34_spill]] %s3804_s0  ;;  %s363_s12 = ssub.s32 %s3630_s17, %s4603_s22 }
  0x2e   : > { %p364_p9 = scmp.eq.s32.totalorder %s363_s12, 0  ;;  %p376_p10 = scmp.ne.s32.totalorder %s3602_s27, %s3598_s26 }
  0x2f   : > { %p377_p11 = scmp.eq.s32.totalorder %s3781_s19, 3  ;;  %p382_p13 = scmp.ne.s32.totalorder %s3598_s26, %s3594_s25 }
  0x30   : > { %s3817_s28 = scalar_select %p364_p9, %s3602_s27, %s366_s11  }
  0x31   : > { %p3819_p12 = por %p377_p11, %p376_p10  ;;  %p383_p0 = scmp.eq.s32.totalorder %s2641_s20, 3 }
  0x32   : > { %4538 = sst [smem:[#allocation35_spill]] %s3817_s28  ;;  %p3041_p1 = scmp.lt.s32.totalorder %s3634_s18, 4 }
  0x33   : > { %s4539_s24 = scalar_select %p3819_p12, 1, 0 }
  0x34   : > { %s3827_s23 = sand.u32 1, %s3614_s30   ;;  %p3829_p2 = por %p383_p0, %p382_p13 }
  0x35   : > { %4540 = sst [smem:[#allocation36_spill]] %s4539_s24  ;;  %s4491_s12 = sand.u32 1, %s3634_s18  }
  0x36   : > { %s4541_s22 = scalar_select %p3829_p2, 1, 0 }
  0x37   : > { %p3836_p4 = pnand %p3041_p1, %p3795_p3  ;;  %s2645_s17 = sshll.u32 %s3827_s23, 6 }
  0x38   : > { %4542 = sst [smem:[#allocation37_spill]] %s4541_s22  ;;  %s2831_s0 = sshll.u32 %s3626_s16, 10 }
  0x39   : > { %s4543_s11 = scalar_select %p3836_p4, 1, 0 }
  0x3a   : > { %s4544_s3 = sld [smem:[#allocation42_spill]]  ;;  %s435_s30 = scalar_lea.vmem [#allocation7], %s2645_s17 }
  0x3b   : > { %s442_s22 = sshll.u32 %s435_s30, 4  ;;  %s3852_s13 = scalar_lea.sflag [#allocation8], %s4491_s12  ;;  %s3847_s22 = int_to_ptr.vmem [resolvable:$true] %s442_s22 }
  0x3c   : > { %p3858_p6 = pneg %p3836_p4 }
  0x40   : > { %s3845_s20 = scalar_lea.hbm %s4544_s3, %s2831_s0  ;;  %s3327_s30 = scalar_lea.hbm %s4544_s3, 2048 }
  0x41   : > { %s3322_s25 = scalar_lea.hbm %s3845_s20, 1024  ;;  %p3328_p10 = scmp.lt.u32.totalorder %s3845_s20, %s4544_s3 }
  0x42   : > { %p3323_p5 = scmp.ne.s32.totalorder %s3845_s20, %s3322_s25  ;;  %p3329_p11 = scmp.lt.u32.totalorder %s3327_s30, %s3322_s25 }
  0x43   : > { %p3331_p0 = scmp.lt.u32.totalorder %s3322_s25, %s3845_s20 }
  0x44   : > { %p3325_p7 = pnand %p3858_p6, %p3323_p5  ;;  %p3330_p13 = por %p3329_p11, %p3328_p10 }
  0x46   : > { %p3326_p9 = pneg %p3325_p7  ;;  %p3332_p1 = por %p3331_p0, %p3330_p13 }
  0x48   : > { %p3333_p3 = pnand %p3332_p1, %p3326_p9 }
  0x4a   : > { %3336 = shalt.err (!%p3333_p3)
}
  0x4b   : > { %s3337_s12 = scalar_lea.vmem %s3847_s22, 1024  ;;  %s3636_s0 = smov [#allocation7]  }
  0x4c   : > { %p3338_p5 = scmp.ne.s32.totalorder %s3847_s22, %s3337_s12  ;;  %s3342_s27 = sshll.u32 %s3636_s0, 4  ;;  %s3343_s27 = int_to_ptr.vmem [resolvable:$false] %s3342_s27 }
  0x4d   : > { %s3344_s17 = scalar_lea.vmem %s3343_s27, 2048  ;;  %p3345_p12 = scmp.lt.s32.totalorder %s3847_s22, %s3343_s27 }
  0x4e   : > { %p3340_p7 = pnand %p3338_p5, %p3858_p6  ;;  %p3346_p8 = scmp.lt.s32.totalorder %s3344_s17, %s3337_s12 }
  0x50   : > { %p3341_p2 = pneg %p3340_p7  ;;  %p3347_p10 = por %p3346_p8, %p3345_p12 }
  0x52   : > { %p3348_p11 = pnand %p3347_p10, %p3341_p2 }
  0x54   : > { %3351 = shalt.err (!%p3348_p11)
}
  0x55   : > { %s4494_s25 = smov 64   ;;  %s4495_s30 = smov 4  }
  0x56   : > { %3027 = dma.hbm_to_vmem [thread:$0]  (!%p3836_p4), %s3845_s20, 1024, %s3847_s22, %s3852_s13, %s4494_s25, %s4494_s25, %s4495_s30  }
  0x57   : > { %p546_p8 = scmp.lt.s32.totalorder %s3634_s18, 5  ;;  %s2649_s12 = sshll.u32 %s3827_s23, 8 }
  0x58   : > { %s4497_s28 = sshll.u32 %s3626_s16, 12  ;;  %p4546_p12 = scmp.ge.s32.totalorder %s3634_s18, 1 }
  0x59   : > { %s4548_s7 = sld [smem:[#allocation46_spill]]  ;;  %s485_s22 = scalar_lea.vmem [#allocation10], %s2649_s12 }
  0x5a   : > { %p3890_p2 = pnand %p4546_p12, %p546_p8  ;;  %s492_s20 = sshll.u32 %s485_s22, 4  ;;  %s3903_s20 = int_to_ptr.vmem [resolvable:$true] %s492_s20 }
  0x5b   : > { %s4549_s25 = sand.u32 1, %s3634_s18  }
  0x5c   : > { %s4547_s0 = scalar_select %p3890_p2, 1, 0 }
  0x5d   : > { %s3907_s30 = scalar_lea.sflag [#allocation11], %s4549_s25 }
  0x5f   : > { %s3899_s3 = scalar_lea.hbm %s4548_s7, %s4497_s28  ;;  %s3357_s28 = scalar_lea.hbm %s4548_s7, 8192 }
  0x60   : > { %s3352_s10 = scalar_lea.hbm %s3899_s3, 4096  ;;  %p3358_p0 = scmp.lt.u32.totalorder %s3899_s3, %s4548_s7 }
  0x61   : > { %p3353_p3 = scmp.ne.s32.totalorder %s3899_s3, %s3352_s10  ;;  %p3359_p1 = scmp.lt.u32.totalorder %s3357_s28, %s3352_s10 }
  0x62   : > { %p3361_p7 = scmp.lt.u32.totalorder %s3352_s10, %s3899_s3 }
  0x63   : > { %p3355_p9 = pnand %p3353_p3, %p3858_p6  ;;  %p3360_p5 = por %p3359_p1, %p3358_p0 }
  0x65   : > { %p3356_p13 = pneg %p3355_p9  ;;  %p3362_p10 = por %p3361_p7, %p3360_p5 }
  0x67   : > { %p3363_p11 = pnand %p3362_p10, %p3356_p13 }
  0x69   : > { %3366 = shalt.err (!%p3363_p11)
}
  0x6a   : > { %s3367_s25 = scalar_lea.vmem %s3903_s20, 4096  ;;  %s3639_s22 = smov [#allocation10]  }
  0x6b   : > { %p3368_p8 = scmp.ne.s32.totalorder %s3903_s20, %s3367_s25  ;;  %s3372_s27 = sshll.u32 %s3639_s22, 4  ;;  %s3373_s27 = int_to_ptr.vmem [resolvable:$false] %s3372_s27 }
  0x6c   : > { %s3374_s2 = scalar_lea.vmem %s3373_s27, 8192  ;;  %p3375_p9 = scmp.lt.s32.totalorder %s3903_s20, %s3373_s27 }
  0x6d   : > { %p3370_p12 = pnand %p3368_p8, %p3858_p6  ;;  %p3376_p2 = scmp.lt.s32.totalorder %s3374_s2, %s3367_s25 }
  0x6f   : > { %p3371_p3 = pneg %p3370_p12  ;;  %p3377_p0 = por %p3376_p2, %p3375_p9 }
  0x71   : > { %p3378_p1 = pnand %p3377_p0, %p3371_p3 }
  0x73   : > { %3381 = shalt.err (!%p3378_p1)
}
  0x74   : > { %s3640_s8 = smov 128   ;;  %s3641_s10 = smov 8  }
  0x75   : > { %3033 = dma.hbm_to_vmem [thread:$0]  (!%p3836_p4), %s3899_s3, 4096, %s3903_s20, %s3907_s30, %s3640_s8, %s3640_s8, %s3641_s10  }
  0x76   : > { %s4550_s28 = sshll.u32 %s3626_s16, 12  ;;  %s4551_s9 = sld [smem:[#allocation48_spill]] }
  0x77   : > { %s513_s27 = scalar_lea.vmem [#allocation12], %s2649_s12  ;;  %s3002_s7 = smul.u32 192, %s3827_s23 }
  0x78   : > { %s520_s2 = sshll.u32 %s513_s27, 4  ;;  %s3003_s18 = smul.u32 3072, %s3626_s16  ;;  %s3940_s2 = int_to_ptr.vmem [resolvable:$true] %s520_s2 }
  0x79   : > { %s4552_s1 = sld [smem:[#allocation40_spill]]  ;;  %s407_s3 = scalar_lea.vmem [#allocation4], %s3002_s7 }
  0x7a   : > { %s414_s20 = sshll.u32 %s407_s3, 4  ;;  %s2648_s8 = sshll.u32 %s3626_s16, 4  ;;  %s3949_s20 = int_to_ptr.vmem [resolvable:$true] %s414_s20 }
  0x7b   : > { %s404_s12 = scalar_lea.sflag [#allocation5], %s3827_s23 }
  0x7c   : > { %s3936_s22 = scalar_lea.hbm %s4551_s9, %s4550_s28 }
  0x7f   : > { %s3947_s15 = scalar_lea.hbm %s4552_s1, %s3003_s18  ;;  %s3387_s5 = scalar_lea.hbm %s4552_s1, 6144 }
  0x80   : > { %s3382_s10 = scalar_lea.hbm %s3947_s15, 3072  ;;  %p3388_p7 = scmp.lt.u32.totalorder %s3947_s15, %s4552_s1 }
  0x81   : > { %p3383_p2 = scmp.ne.s32.totalorder %s3947_s15, %s3382_s10  ;;  %p3389_p10 = scmp.lt.u32.totalorder %s3387_s5, %s3382_s10 }
  0x82   : > { %p3391_p8 = scmp.lt.u32.totalorder %s3382_s10, %s3947_s15 }
  0x83   : > { %p3385_p13 = pnand %p3383_p2, %p3858_p6  ;;  %p3390_p11 = por %p3389_p10, %p3388_p7 }
  0x85   : > { %p3386_p5 = pneg %p3385_p13  ;;  %p3392_p12 = por %p3391_p8, %p3390_p11 }
  0x87   : > { %p3393_p3 = pnand %p3392_p12, %p3386_p5 }
  0x89   : > { %3396 = shalt.err (!%p3393_p3)
}
  0x8a   : > { %s3397_s7 = scalar_lea.vmem %s3949_s20, 3072  ;;  %s3642_s25 = smov [#allocation4]  }
  0x8b   : > { %p3398_p9 = scmp.ne.s32.totalorder %s3949_s20, %s3397_s7  ;;  %s3402_s27 = sshll.u32 %s3642_s25, 4  ;;  %s3403_s27 = int_to_ptr.vmem [resolvable:$false] %s3402_s27 }
  0x8c   : > { %s3404_s3 = scalar_lea.vmem %s3403_s27, 6144  ;;  %p3405_p2 = scmp.lt.s32.totalorder %s3949_s20, %s3403_s27 }
  0x8d   : > { %p3400_p0 = pnand %p3398_p9, %p3858_p6  ;;  %p3406_p13 = scmp.lt.s32.totalorder %s3404_s3, %s3397_s7 }
  0x8f   : > { %p3401_p1 = pneg %p3400_p0  ;;  %p3407_p7 = por %p3406_p13, %p3405_p2 }
  0x91   : > { %p3408_p10 = pnand %p3407_p7, %p3401_p1 }
  0x93   : > { %3411 = shalt.err (!%p3408_p10)
}
  0x94   : > { %s3643_s10 = smov 192   ;;  %s3644_s28 = smov 12  }
  0x95   : > { %3024 = dma.hbm_to_vmem [thread:$0]  (!%p3836_p4), %s3947_s15, 3072, %s3949_s20, %s404_s12, %s3643_s10, %s3643_s10, %s3644_s28  }
  0x96   : > { %s4553_s4 = sld [smem:[#allocation43_spill]]  ;;  %s455_s18 = scalar_lea.vmem [#allocation9], %s3827_s23 }
  0x97   : > { %s462_s7 = sshll.u32 %s455_s18, 4  ;;  %s463_s7 = int_to_ptr.vmem [resolvable:$true] %s462_s7 }
  0x9c   : > { %s3981_s6 = scalar_lea.hbm %s4553_s4, %s2648_s8  ;;  %s3417_s20 = scalar_lea.hbm %s4553_s4, 32 }
  0x9d   : > { %s3412_s25 = scalar_lea.hbm %s3981_s6, 16  ;;  %p3418_p12 = scmp.lt.u32.totalorder %s3981_s6, %s4553_s4 }
  0x9e   : > { %p3413_p5 = scmp.ne.s32.totalorder %s3981_s6, %s3412_s25  ;;  %p3419_p3 = scmp.lt.u32.totalorder %s3417_s20, %s3412_s25 }
  0x9f   : > { %p3421_p0 = scmp.lt.u32.totalorder %s3412_s25, %s3981_s6 }
  0xa0   : > { %p3415_p11 = pnand %p3413_p5, %p3858_p6  ;;  %p3420_p9 = por %p3419_p3, %p3418_p12 }
  0xa2   : > { %p3416_p8 = pneg %p3415_p11  ;;  %p3422_p1 = por %p3421_p0, %p3420_p9 }
  0xa4   : > { %p3423_p2 = pnand %p3422_p1, %p3416_p8 }
  0xa6   : > { %3426 = shalt.err (!%p3423_p2)
}
  0xa7   : > { %s3427_s23 = scalar_lea.vmem %s463_s7, 16  ;;  %s3645_s8 = smov [#allocation9]  }
  0xa8   : > { %p3428_p13 = scmp.ne.s32.totalorder %s463_s7, %s3427_s23  ;;  %s3432_s10 = sshll.u32 %s3645_s8, 4  ;;  %s3433_s10 = int_to_ptr.vmem [resolvable:$false] %s3432_s10 }
  0xa9   : > { %s3434_s28 = scalar_lea.vmem %s3433_s10, 32  ;;  %p3435_p5 = scmp.lt.s32.totalorder %s463_s7, %s3433_s10 }
  0xaa   : > { %p3430_p7 = pnand %p3428_p13, %p3858_p6  ;;  %p3436_p11 = scmp.lt.s32.totalorder %s3434_s28, %s3427_s23 }
  0xac   : > { %p3431_p10 = pneg %p3430_p7  ;;  %p3437_p4 = por %p3436_p11, %p3435_p5 }
  0xae   : > { %p3438_p3 = pnand %p3437_p4, %p3431_p10 }
  0xb0   : > { %3441 = shalt.err (!%p3438_p3)
}
  0xb1   : > { %p4554_p12 = scmp.ne.s32.totalorder %s4543_s11, 0  ;;  %s3442_s17 = scalar_lea.hbm %s3936_s22, 4096 }
  0xb2   : > { %p3443_p8 = scmp.ne.s32.totalorder %s3936_s22, %s3442_s17  ;;  %s3447_s25 = scalar_lea.hbm %s4551_s9, 8192 }
  0xb3   : > { %3030 = dma.hbm_to_vmem [thread:$0]  (!%p4554_p12), %s3981_s6, 16, %s463_s7, %s3852_s13  }
  0xb4   : > { %p3445_p9 = pnand %p3443_p8, %p3858_p6  ;;  %p3448_p4 = scmp.lt.u32.totalorder %s3936_s22, %s4551_s9 }
  0xb5   : > { %p3449_p1 = scmp.lt.u32.totalorder %s3447_s25, %s3442_s17  ;;  %p3451_p13 = scmp.lt.u32.totalorder %s3442_s17, %s3936_s22 }
  0xb6   : > { %p3446_p0 = pneg %p3445_p9 }
  0xb7   : > { %p3450_p2 = por %p3449_p1, %p3448_p4 }
  0xb9   : > { %p3452_p7 = por %p3451_p13, %p3450_p2 }
  0xbb   : > { %p3453_p10 = pnand %p3452_p7, %p3446_p0 }
  0xbd   : > { %3456 = shalt.err (!%p3453_p10)
}
  0xbe   : > { %s3457_s13 = scalar_lea.vmem %s3940_s2, 4096  ;;  %s3646_s6 = smov [#allocation12]  }
  0xbf   : > { %p3458_p5 = scmp.ne.s32.totalorder %s3940_s2, %s3457_s13  ;;  %s3462_s7 = sshll.u32 %s3646_s6, 4  ;;  %s3463_s7 = int_to_ptr.vmem [resolvable:$false] %s3462_s7 }
  0xc0   : > { %s3464_s20 = scalar_lea.vmem %s3463_s7, 8192  ;;  %p3465_p8 = scmp.lt.s32.totalorder %s3940_s2, %s3463_s7 }
  0xc1   : > { %p3460_p11 = pnand %p3458_p5, %p3858_p6  ;;  %p3466_p9 = scmp.lt.s32.totalorder %s3464_s20, %s3457_s13 }
  0xc3   : > { %p3461_p3 = pneg %p3460_p11  ;;  %p3467_p4 = por %p3466_p9, %p3465_p8 }
  0xc5   : > { %p3468_p1 = pnand %p3467_p4, %p3461_p3 }
  0xc7   : > { %3471 = shalt.err (!%p3468_p1)
}
  0xc8   : > { %s4555_s12 = smov 4   ;;  %s4556_s3 = smov 64  }
  0xc9   : > { %3036 = dma.hbm_to_vmem [thread:$0]  (!%p4554_p12), %s3936_s22, 4096, %s3940_s2, %s3907_s30, %s4556_s3, %s4556_s3, %s4555_s12  }
  0xca   : > { %p4557_p6 = scmp.ne.s32.totalorder %s4547_s0, 0 }
  0xcc   : > { %550 = sbr.rel (%p4557_p6) target bundleno = 3320 (0xcf8), region = 68 }
  0xd3   : > { %s4030_s24 = sand.u32 1, %s3610_s29   ;;  %p4558_p0 = scmp.ne.s32.totalorder %s4537_s21, 0 }
  0xd4   : > { %s3004_s23 = smul.u32 192, %s4030_s24  ;;  %s553_s8 = scalar_lea.sflag [#allocation5], %s4030_s24 }
  0xd6   : > { %s4034_s10 = scalar_lea.vmem [#allocation4], %s3004_s23 }
  0xd7   : > { %3573 = dma.done.wait (%p4558_p0), %s553_s8, 3072  }
  0xd8   : > { %3575 = vsyncadd (%p4558_p0), %s553_s8, 4294964224  ;;  %s561_s11 = sand.u32 1, %s3781_s19   ;;  %s2656_s30 = sshll.u32 %s4030_s24, 6 }
  0xd9   : > { %s562_s0 = scalar_lea.sflag [#allocation8], %s561_s11  ;;  %s4042_s22 = scalar_lea.vmem [#allocation7], %s2656_s30 }
  0xda   : > { %3577 = dma.done.wait (%p4558_p0), %s562_s0, 1040  }
  0xdb   : > { %3579 = vsyncadd (%p4558_p0), %s562_s0, 4294966256  ;;  %s4505_s2 = sshll.u32 %s4030_s24, 8  ;;  %s579_s17 = scalar_lea.sflag [#allocation11], %s561_s11 }
  0xdc   : > { %s4052_s5 = scalar_lea.vmem [#allocation10], %s4505_s2 }
  0xdd   : > { %4559 = sst [smem:[#allocation38_spill]] %s4052_s5 }
  0xde   : > { %3581 = dma.done.wait (%p4558_p0), %s579_s17, 8192  }
  0xdf   : > { %3583 = vsyncadd (%p4558_p0), %s579_s17, 4294959104  ;;  %s4560_s19 = sld [smem:[#allocation28_spill]]  ;;  %s4504_s18 = sand.u32 1, %s3598_s26  }
  0xe0   : > { %s4061_s25 = sshll.u32 %s4504_s18, 4  ;;  %p674_p12 = scmp.lt.s32.totalorder %s3618_s14, 1 }
  0xe1   : > { %s4563_s17 = sld [smem:[#allocation41_spill]]  ;;  %s4564_s1 = sld [smem:[#allocation47_spill]] }
  0xe2   : > { %s4065_s27 = scalar_select %p674_p12, %s3618_s14, 1 }
  0xe3   : > { %s4565_s13 = sld [smem:[#allocation49_spill]]  ;;  %s4566_s29 = sld [smem:[#allocation50_spill]] }
  0xe4   : > { %s3005_s15 = smul.u32 3, %s4065_s27  ;;  %s2660_s11 = sshll.u32 %s4065_s27, 2 }
  0xe5   : > { %s2834_s21 = sshll.u32 %s4560_s19, 7  ;;  %s4568_s26 = sld [smem:[#allocation51_spill]] }
  0xe6   : > { %p3042_p2 = scmp.eq.s32.totalorder %s3618_s14, 0  ;;  %s4570_s0 = sld [smem:[#allocation39_spill]] }
  0xe7   : > { %s4081_s18 = scalar_lea.vmem %s4563_s17, %s3005_s15  ;;  %s4086_s19 = scalar_lea.vmem %s4564_s1, %s2660_s11 }
  0xe8   : > { %s3647_s2 = smov [#allocation2]  }
  0xe9   : > { %s690_s6 = scalar_lea.vmem %s4565_s13, %s4065_s27  ;;  %s693_s12 = scalar_lea.vmem %s4566_s29, %s4065_s27 }
  0xea   : > { %s712_s1 = sshll.u32 %s3647_s2, 4  ;;  %s713_s1 = int_to_ptr.vmem [resolvable:$true] %s712_s1 }
  0xeb   : > { %s696_s5 = scalar_lea.vmem %s4568_s26, %s4065_s27 }
  0xec   : > { %s704_s17 = scalar_lea.hbm %s4570_s0, %s2834_s21  ;;  %s3476_s29 = scalar_lea.hbm %s4570_s0, 256 }
  0xed   : > { %s3472_s28 = scalar_lea.hbm %s704_s17, 128  ;;  %p3477_p5 = scmp.lt.u32.totalorder %s704_s17, %s4570_s0 }
  0xee   : > { %p3473_p13 = scmp.ne.s32.totalorder %s704_s17, %s3472_s28  ;;  %p3478_p11 = scmp.lt.u32.totalorder %s3476_s29, %s3472_s28 }
  0xef   : > { %p3480_p8 = scmp.lt.u32.totalorder %s3472_s28, %s704_s17 }
  0xf0   : > { %p3474_p7 = pnand %p3473_p13, %p3042_p2  ;;  %p3479_p3 = por %p3478_p11, %p3477_p5 }
  0xf2   : > { %p3475_p10 = pneg %p3474_p7  ;;  %p3481_p9 = por %p3480_p8, %p3479_p3 }
  0xf4   : > { %p3482_p4 = pnand %p3481_p9, %p3475_p10 }
  0xf6   : > { %3485 = shalt.err (!%p3482_p4)  }
  0xf7   : > { %s3486_s26 = scalar_lea.vmem %s713_s1, 128  ;;  %p3493_p12 = scmp.lt.s32.totalorder %s713_s1, %s713_s1 }
  0xf8   : > { %p3487_p1 = scmp.ne.s32.totalorder %s713_s1, %s3486_s26  ;;  %p3494_p13 = scmp.lt.s32.totalorder %s3486_s26, %s3486_s26 }
  0xfa   : > { %p3488_p6 = pnand %p3487_p1, %p3042_p2  ;;  %p3495_p7 = por %p3494_p13, %p3493_p12 }
  0xfc   : > { %p3489_p0 = pneg %p3488_p6 }
  0xfe   : > { %p3496_p5 = pnand %p3495_p7, %p3489_p0 }
 0x100   : > { %3499 = shalt.err (!%p3496_p5)  }
 0x101   : > { %3017 = dma.hbm_to_vmem [thread:$0]  (%p3042_p2), %s704_s17, 128, %s713_s1, [#allocation3] }
 0x102   : > { %s4571_s21 = sshll.u32 %s4030_s24, 8  ;;  %s4121_s11 = scalar_lea.vmem [#allocation13], %s4061_s25 }
 0x103   : > { %s4118_s8 = scalar_lea.vmem [#allocation12], %s4571_s21 }
 0x104   : > { %3585 = dma.done.wait (%p3042_p2), [#allocation3], 128 }
 0x105   : > { %3587 = vsyncadd (%p3042_p2), [#allocation3], 4294967168  ;;  %v3648_v0 = vmov 0   ;;  %v3649_v1 = vmov 0.0   ;;  %v3162_v2 = vld [vmem:[%s4034_s10 + $0x4] ss:$12 sps:$4 sm:$0xff]   ;;  %v758_v27 = vlaneseq }
 0x106   : > { %933 = vmatprep.mubr.bf16.mxu0 %v3648_v0  ;;  %2914 = vmatprep.subr.bf16.mxu1 %v3649_v1  ;;  %v3164_v3 = vld [vmem:[%s4034_s10] ss:$12 sps:$4 sm:$0xff]   ;;  %v3165_v4 = vld [vmem:[%s4034_s10 + $0x1c] ss:$12 sps:$4 sm:$0xff]   ;;  %v3167_v5 = vld [vmem:[%s4034_s10 + $0x18] ss:$12 sps:$4 sm:$0xff]  }
 0x107   : > { %901 = vmatprep.subr.bf16.mxu0 %v3162_v2  ;;  %v3168_v6 = vld [vmem:[%s4034_s10 + $0x34] ss:$12 sps:$4 sm:$0xff]   ;;  %v3170_v7 = vld [vmem:[%s4034_s10 + $0x30] ss:$12 sps:$4 sm:$0xff]   ;;  %v3171_v8 = vld [vmem:[%s4034_s10 + $0x4c] ss:$12 sps:$4 sm:$0xff]  }
 0x108   : > { %902 = vmatpush1.bf16.msra.mxu0 %v3164_v3  ;;  %v3173_v9 = vld [vmem:[%s4034_s10 + $0x48] ss:$12 sps:$4 sm:$0xff]   ;;  %v3174_v11 = vld [vmem:[%s4034_s10 + $0x64] ss:$12 sps:$4 sm:$0xff]   ;;  %v3187_v12 = vld [vmem:[%s4034_s10 + $0x20] ss:$12 sps:$4 sm:$0xff]  }
 0x109   : > { %903 = vmatprep.subr.bf16.mxu0 %v3165_v4  ;;  %v3186_v10 = vld [vmem:[%s4034_s10 + $0x8] ss:$12 sps:$4 sm:$0xff]   ;;  %v3176_v13 = vld [vmem:[%s4034_s10 + $0x60] ss:$12 sps:$4 sm:$0xff]   ;;  %v3179_v15 = vld [vmem:[%s4034_s10 + $0x78] ss:$12 sps:$4 sm:$0xff]  }
 0x10a   : > { %2915 = vmatpush3.bf16.msra.mxu1 %v3186_v10  ;;  %v3177_v14 = vld [vmem:[%s4034_s10 + $0x7c] ss:$12 sps:$4 sm:$0xff]   ;;  %v3188_v16 = vld [vmem:[%s4034_s10 + $0x38] ss:$12 sps:$4 sm:$0xff]   ;;  %v3180_v17 = vld [vmem:[%s4034_s10 + $0x94] ss:$12 sps:$4 sm:$0xff]  }
 0x10b   : > { %2916 = vmatprep.subr.bf16.mxu1 %v3649_v1  ;;  %v3189_v18 = vld [vmem:[%s4034_s10 + $0x50] ss:$12 sps:$4 sm:$0xff]   ;;  %v3183_v20 = vld [vmem:[%s4034_s10 + $0xac] ss:$12 sps:$4 sm:$0xff]   ;;  %v3190_v21 = vld [vmem:[%s4034_s10 + $0x68] ss:$12 sps:$4 sm:$0xff]  }
 0x10c   : > { %904 = vmatpush1.bf16.msra.mxu0 %v3167_v5  ;;  %v3182_v19 = vld [vmem:[%s4034_s10 + $0x90] ss:$12 sps:$4 sm:$0xff]   ;;  %v3185_v22 = vld [vmem:[%s4034_s10 + $0xa8] ss:$12 sps:$4 sm:$0xff]   ;;  %v3191_v23 = vld [vmem:[%s4034_s10 + $0x80] ss:$12 sps:$4 sm:$0xff]  }
 0x10d   : > { %905 = vmatprep.subr.bf16.mxu0 %v3168_v6  ;;  %v4155_v24 = vld [vmem:[#allocation2] sm:$0xff]  ;;  %vm3650_vm0 = vmmov 0   ;;  %v759_v28 = vshrl.u32 %v758_v27, 7  ;;  %vm990_vm1 = vcmask 261120   ;;  %vm1038_vm2 = vcmask 130048   ;;  %s3653_s25 = smov 64  }
 0x10e   : > { %2917 = vmatpush3.bf16.msra.mxu1 %v3187_v12  ;;  %v3192_v25 = vld [vmem:[%s4034_s10 + $0x98] ss:$12 sps:$4 sm:$0xff]   ;;  %v3193_v26 = vld [vmem:[%s4034_s10 + $0xb0] ss:$12 sps:$4 sm:$0xff]   ;;  %2930 = vmatprep.mubr.msk.bf16.mxu1 %vm3650_vm0, %v3649_v1  ;;  %s3651_s10 = smov 96   ;;  %vm1498_vm3 = vcmask 523264  }
 0x10f   : > { %2918 = vmatprep.subr.bf16.mxu1 %v3649_v1  ;;  %v4172_v29 = vsub.s32 0, %v759_v28  ;;  %v756_v30 = vld [vmem:[%s4081_s18] sm:$0x7]  ;;  %v4175_v31 = vsub.s32 1, %v759_v28  ;;  %v768_v47 = vsub.s32 2, %v759_v28  ;;  %s3652_s18 = smov 32  }
 0x110   : > { %906 = vmatpush1.bf16.msra.mxu0 %v3170_v7  ;;  %vm1501_vm4 = vcmask 785408   ;;  %s4573_s3 = scalar_lea.vmem [#allocation9], %s4030_s24  ;;  %s4574_s30 = sld [smem:[#allocation44_spill]] }
 0x111   : > { %907 = vmatprep.subr.bf16.mxu0 %v3171_v8  ;;  %v761_v32 = vrot.slane %v756_v30, %v4172_v29  ;;  %v765_v34 = vrot.slane %v756_v30, %v4175_v31  ;;  %v769_v48 = vrot.slane %v756_v30, %v768_v47  ;;  %s4576_s28 = sld [smem:[#allocation45_spill]]  ;;  %p2823_p2 = scmp.ge.s32.totalorder %s3618_s14, 1 }
 0x112   : > { %2919 = vmatpush3.bf16.msra.mxu1 %v3188_v16 }
 0x113   : > { %2920 = vmatprep.subr.bf16.mxu1 %v3649_v1 }
 0x114   : > { %908 = vmatpush1.bf16.msra.mxu0 %v3173_v9 }
 0x115   : > { %909 = vmatprep.subr.bf16.mxu0 %v3174_v11 }
 0x116   : > { %2921 = vmatpush3.bf16.msra.mxu1 %v3189_v18  ;;  %s4575_s17 = scalar_lea.vmem %s4574_s30, %s4065_s27 }
 0x117   : > { %2922 = vmatprep.subr.bf16.mxu1 %v3649_v1  ;;  %s4577_s4 = scalar_lea.vmem %s4576_s28, %s4065_s27 }
 0x118   : > { %910 = vmatpush1.bf16.msra.mxu0 %v3176_v13 }
 0x119   : > { %911 = vmatprep.subr.bf16.mxu0 %v3177_v14 }
 0x11a   : > { %2923 = vmatpush3.bf16.msra.mxu1 %v3190_v21 }
 0x11b   : > { %2924 = vmatprep.subr.bf16.mxu1 %v3649_v1 }
 0x11c   : > { %912 = vmatpush1.bf16.msra.mxu0 %v3179_v15 }
 0x11d   : > { %913 = vmatprep.subr.bf16.mxu0 %v3180_v17 }
 0x11e   : > { %2925 = vmatpush3.bf16.msra.mxu1 %v3191_v23 }
 0x11f   : > { %2926 = vmatprep.subr.bf16.mxu1 %v3649_v1 }
 0x120   : > { %914 = vmatpush1.bf16.msra.mxu0 %v3182_v19 }
 0x121   : > { %915 = vmatprep.subr.bf16.mxu0 %v3183_v20 }
 0x122   : > { %2927 = vmatpush3.bf16.msra.mxu1 %v3192_v25 }
 0x123   : > { %2928 = vmatprep.subr.bf16.mxu1 %v3649_v1 }
 0x124   : > { %916 = vmatpush1.bf16.msra.mxu0 %v3185_v22 }
 0x125   : > { %2958 = vmatprep.subr.bf16.mxu0 %v3649_v1 }
 0x126   : > { %2929 = vmatpush3.bf16.msra.mxu1 %v3193_v26 }
 0x127   : > { %934 = vmatmul.mubr.bf16.vlgmr.msra.gmra.mrb[0].mxu0 %v4155_v24  ;;  %2934 = vmatprep.subr.bf16.mxu1 %v3649_v1 }
 0x128   : > { %2960 = vmatprep.mubr.msk.bf16.mxu0 %vm3650_vm0, %v3649_v1 }
 0x129   : > { %2931 = vmatmul.mubr.bf16.vlgmr.msra.gmra.mrb[0].mxu1 %v4155_v24 }
 0x12a   : > { %2936 = vmatprep.mubr.msk.bf16.mxu1 %vm3650_vm0, %v3649_v1 }
 0x1fa   : > { %v935_v33 = vpop.f32.mrb[0].mxu0 }
 0x1fb   : > { %v936_v35 = vadd.f32 %v935_v33, %v761_v32  ;;  %v937_v36 = vpop.f32.mrb[1].mxu0 }
 0x1fc   : > { %v939_v37 = vpop.f32.mrb[2].mxu0  ;;  %v938_v40 = vadd.f32 %v937_v36, %v765_v34  ;;  %v978_v49 = vpop.f32.mrb[0].mxu1 }
 0x1fd   : > { %v940_v38 = vadd.f32 %v939_v37, %v761_v32  ;;  %v941_v39 = vpop.f32.mrb[3].mxu0  ;;  %v985_v42 = vmul.f32 0.17677669, %v936_v35  ;;  %v979_v50 = vadd.f32 %v978_v49, %v769_v48  ;;  %v2932_v51 = vpop.f32.mrb[1].mxu1 }
 0x1fe   : > { %v942_v41 = vadd.f32 %v941_v39, %v765_v34  ;;  %v981_v52 = vpop.f32.mrb[2].mxu1 }
 0x1ff   : > { %v986_v43 = vmul.f32 0.17677669, %v940_v38  ;;  %v982_v53 = vadd.f32 %v981_v52, %v769_v48  ;;  %v2933_v54 = vpop.f32.mrb[3].mxu1 }
 0x200   : > { %v988_v44 = vpack.c.bf16 %v942_v41, %v938_v40 }
 0x201   : > { %v987_v45 = vpack.c.bf16 %v986_v43, %v985_v42  ;;  %v4184_v55 = vpack.c.bf16 %v982_v53, %v979_v50 }
 0x202   : > { %v995_v46 = vsel %vm990_vm1, %v988_v44, 0 }
 0x203   : > { %2935 = vmatpush3.bf16.xpose.msra.mxu1 %v995_v46 }
 0x204   : > { %2940 = vmatprep.subr.bf16.mxu1 %v3649_v1 }
 0x20a   : > { %2937 = vmatmul.mubr.msk.bf16.vlgmr.msra.gmra.mrb[4].mxu1 %vm990_vm1, %v987_v45 }
 0x20b   : > { %2942 = vmatprep.mubr.msk.bf16.mxu1 %vm3650_vm0, %v3649_v1  ;;  %2941 = vmatpush3.bf16.msra.mxu1 %v4184_v55 }
 0x20c   : > { %2946 = vmatprep.subr.bf16.mxu1 %v3649_v1 }
 0x2dd   : > { %v1031_v56 = vpop.f32.mrb[4].mxu1 }
 0x2de   : > { %v2938_v57 = vpop.f32.mrb[5].mxu1  ;;  %v1039_v58 = vsel %vm1038_vm2, %v1031_v56, -inf }
 0x2df   : > { %1040 = vmax.xlane.f32.xlu0 %v1039_v58  ;;  %v1034_v59 = vpop.f32.mrb[6].mxu1 }
 0x2e0   : > { %v2939_v60 = vpop.f32.mrb[7].mxu1  ;;  %v1042_v61 = vsel %vm1038_vm2, %v1034_v59, -inf }
 0x2e3   : > { %1043 = vmax.xlane.f32.xlu0 %v1042_v61 }
 0x2f9   : > { %1110 = vrot.lane.b32.xlu0 %v988_v44, %s3651_s10 }
 0x2fd   : > { %1353 = vrot.lane.b32.xlu0 %v988_v44, %s3652_s18 }
 0x36c   : > { %v1041_v62 = vpop.xlane.xlu0 %1040 }
 0x36d   : > { %v1045_v63 = vsub.f32 %v1031_v56, %v1041_v62 }
 0x36f   : > { %v1047_v2 = vmul.f32 1.442695, %v1045_v63 }
 0x370   : > { %v1044_v3 = vpop.xlane.xlu0 %1043 }
 0x371   : > { %3282 = vpow2.f32 %v1047_v2  ;;  %v1046_v4 = vsub.f32 %v1034_v59, %v1044_v3 }
 0x373   : > { %v1049_v5 = vmul.f32 1.442695, %v1046_v4 }
 0x374   : > { %v1111_v13 = vpop.permute.xlu0 %1110 }
 0x375   : > { %3284 = vpow2.f32 %v1049_v5  ;;  %v1116_v22 = vsel %vm990_vm1, %v1111_v13, 0 }
 0x378   : > { %v1354_v20 = vpop.permute.xlu0 %1353 }
 0x379   : > { %v1359_v25 = vsel %vm990_vm1, %v1354_v20, 0 }
 0x37b   : > { %v3283_v6 = vpop.eup %3282 }
 0x37c   : > { %v1051_v7 = vsel %vm1038_vm2, %v3283_v6, 0.0 }
 0x37d   : > { %1052 = vadd.xlane.f32.xlu1 %v1051_v7 }
 0x37f   : > { %v3285_v8 = vpop.eup %3284 }
 0x380   : > { %v1054_v9 = vsel %vm1038_vm2, %v3285_v8, 0.0 }
 0x381   : > { %1055 = vadd.xlane.f32.xlu1 %v1054_v9 }
 0x392   : > { %1107 = vrot.lane.b32.xlu1 %v987_v45, %s3651_s10 }
 0x396   : > { %1232 = vrot.lane.b32.xlu1 %v988_v44, %s3653_s25 }
 0x39a   : > { %1230 = vrot.lane.b32.xlu1 %v987_v45, %s3653_s25 }
 0x39e   : > { %1351 = vrot.lane.b32.xlu1 %v987_v45, %s3652_s18 }
 0x40a   : > { %v1053_v10 = vpop.xlane.xlu1 %1052 }
 0x40b   : > { %3286 = vrcp.f32 %v1053_v10 }
 0x40e   : > { %v1056_v11 = vpop.xlane.xlu1 %1055 }
 0x40f   : > { %3288 = vrcp.f32 %v1056_v11 }
 0x412   : > { %v1108_v12 = vpop.permute.xlu1 %1107 }
 0x415   : > { %v3287_v15 = vpop.eup %3286 }
 0x416   : > { %v1233_v14 = vpop.permute.xlu1 %1232  ;;  %v1058_v18 = vmul.f32 %v3287_v15, %v3283_v6 }
 0x417   : > { %v1238_v16 = vsel %vm990_vm1, %v1233_v14, 0 }
 0x418   : > { %2959 = vmatpush3.bf16.xpose.msra.mxu0 %v1238_v16 }
 0x419   : > { %v3289_v17 = vpop.eup %3288  ;;  %2970 = vmatprep.subr.bf16.mxu0 %v3649_v1 }
 0x41a   : > { %v1060_v19 = vmul.f32 %v3289_v17, %v3285_v8  ;;  %v1231_v23 = vpop.permute.xlu1 %1230 }
 0x41c   : > { %v1061_v21 = vpack.c.bf16 %v1060_v19, %v1058_v18 }
 0x41e   : > { %2943 = vmatmul.mubr.msk.bf16.vlgmr.msra.gmra.mrb[8].mxu1 %vm1038_vm2, %v1061_v21  ;;  %v1352_v26 = vpop.permute.xlu1 %1351 }
 0x41f   : > { %2947 = vmatpush3.bf16.xpose.msra.mxu1 %v1116_v22  ;;  %2961 = vmatmul.mubr.msk.bf16.vlgmr.msra.gmra.mrb[4].mxu0 %vm990_vm1, %v1231_v23 }
 0x420   : > { %2971 = vmatpush3.bf16.xpose.msra.mxu0 %v1359_v25  ;;  %2948 = vmatprep.mubr.msk.bf16.mxu1 %vm3650_vm0, %v3649_v1 }
 0x421   : > { %2972 = vmatprep.mubr.msk.bf16.mxu0 %vm3650_vm0, %v3649_v1  ;;  %2952 = vmatprep.subr.bf16.mxu1 %v3649_v1 }
 0x422   : > { %2982 = vmatprep.subr.bf16.mxu0 %v3649_v1 }
 0x426   : > { %2949 = vmatmul.mubr.msk.bf16.vlgmr.msra.gmra.mrb[12].mxu1 %vm990_vm1, %v1108_v12 }
 0x427   : > { %2973 = vmatmul.mubr.msk.bf16.vlgmr.msra.gmra.mrb[8].mxu0 %vm990_vm1, %v1352_v26  ;;  %2954 = vmatprep.mubr.msk.bf16.mxu1 %vm3650_vm0, %v3649_v1 }
 0x428   : > { %2998 = vmatprep.mubr.msk.bf16.mxu0 %vm3650_vm0, %v3649_v1 }
 0x4f1   : > { %v4216_v27 = vpop.f32.mrb[8].mxu1 }
 0x4f2   : > { %v2944_v28 = vpop.f32.mrb[9].mxu1  ;;  %v1274_v30 = vpop.f32.mrb[4].mxu0 }
 0x4f3   : > { %v4218_v32 = vpop.f32.mrb[10].mxu1  ;;  %v2962_v33 = vpop.f32.mrb[5].mxu0  ;;  %v1281_v47 = vsel %vm1038_vm2, %v1274_v30, -inf }
 0x4f4   : > { %v2945_v34 = vpop.f32.mrb[11].mxu1  ;;  %v1277_v35 = vpop.f32.mrb[6].mxu0 }
 0x4f5   : > { %v2963_v36 = vpop.f32.mrb[7].mxu0  ;;  %v1284_v49 = vsel %vm1038_vm2, %v1277_v35, -inf }
 0x4f9   : > { %v1152_v37 = vpop.f32.mrb[12].mxu1 }
 0x4fa   : > { %v2950_v38 = vpop.f32.mrb[13].mxu1  ;;  %v1395_v39 = vpop.f32.mrb[8].mxu0  ;;  %v1159_v40 = vsel %vm1038_vm2, %v1152_v37, -inf }
 0x4fb   : > { %v2974_v41 = vpop.f32.mrb[9].mxu0  ;;  %1160 = vmax.xlane.f32.xlu0 %v1159_v40  ;;  %v1155_v42 = vpop.f32.mrb[14].mxu1  ;;  %v1402_v50 = vsel %vm1038_vm2, %v1395_v39, -inf }
 0x4fc   : > { %v2951_v43 = vpop.f32.mrb[15].mxu1  ;;  %v1398_v44 = vpop.f32.mrb[10].mxu0  ;;  %v1162_v45 = vsel %vm1038_vm2, %v1155_v42, -inf }
 0x4fd   : > { %v2975_v46 = vpop.f32.mrb[11].mxu0  ;;  %1163 = vmax.xlane.f32.xlu1 %v1162_v45  ;;  %v1405_v48 = vsel %vm1038_vm2, %v1398_v44, -inf }
 0x4ff   : > { %1282 = vmax.xlane.f32.xlu0 %v1281_v47 }
 0x501   : > { %1406 = vmax.xlane.f32.xlu1 %v1405_v48  ;;  %v3194_v48 = vld [vmem:[%s4042_s22] sm:$0xff]  }
 0x502   : > { %2983 = vmatpush3.bf16.msra.mxu0 %v3194_v48 }
 0x503   : > { %1285 = vmax.xlane.f32.xlu0 %v1284_v49  ;;  %v3195_v49 = vld [vmem:[%s4042_s22 + $0x8] sm:$0xff]   ;;  %2984 = vmatprep.subr.bf16.mxu0 %v3649_v1 }
 0x506   : > { %2985 = vmatpush3.bf16.msra.mxu0 %v3195_v49 }
 0x507   : > { %1403 = vmax.xlane.f32.xlu0 %v1402_v50  ;;  %v3196_v50 = vld [vmem:[%s4042_s22 + $0x10] sm:$0xff]   ;;  %2986 = vmatprep.subr.bf16.mxu0 %v3649_v1 }
 0x50a   : > { %2987 = vmatpush3.bf16.msra.mxu0 %v3196_v50 }
 0x50b   : > { %2988 = vmatprep.subr.bf16.mxu0 %v3649_v1 }
 0x588   : > { %v1161_v51 = vpop.xlane.xlu0 %1160 }
 0x589   : > { %v1165_v61 = vsub.f32 %v1152_v37, %v1161_v51  ;;  %v3197_v51 = vld [vmem:[%s4042_s22 + $0x18] sm:$0xff]  }
 0x58a   : > { %v1164_v52 = vpop.xlane.xlu1 %1163  ;;  %2989 = vmatpush3.bf16.msra.mxu0 %v3197_v51 }
 0x58b   : > { %v1166_v62 = vsub.f32 %v1155_v42, %v1164_v52  ;;  %v1167_v5 = vmul.f32 1.442695, %v1165_v61  ;;  %v3198_v52 = vld [vmem:[%s4042_s22 + $0x20] sm:$0xff]   ;;  %2990 = vmatprep.subr.bf16.mxu0 %v3649_v1 }
 0x58c   : > { %v1283_v53 = vpop.xlane.xlu0 %1282 }
 0x58d   : > { %v1287_v54 = vsub.f32 %v1274_v30, %v1283_v53  ;;  %v1169_v6 = vmul.f32 1.442695, %v1166_v62 }
 0x58e   : > { %v1407_v56 = vpop.xlane.xlu1 %1406  ;;  %2991 = vmatpush3.bf16.msra.mxu0 %v3198_v52 }
 0x58f   : > { %v1289_v57 = vmul.f32 1.442695, %v1287_v54  ;;  %v1409_v58 = vsub.f32 %v1398_v44, %v1407_v56  ;;  %2992 = vmatprep.subr.bf16.mxu0 %v3649_v1  ;;  %v3199_v56 = vld [vmem:[%s4042_s22 + $0x28] sm:$0xff]  }
 0x590   : > { %v1286_v59 = vpop.xlane.xlu0 %1285 }
 0x591   : > { %3290 = vpow2.f32 %v1289_v57  ;;  %v1288_v60 = vsub.f32 %v1277_v35, %v1286_v59  ;;  %v1412_v63 = vmul.f32 1.442695, %v1409_v58 }
 0x592   : > { %2993 = vmatpush3.bf16.msra.mxu0 %v3199_v56 }
 0x593   : > { %v1291_v2 = vmul.f32 1.442695, %v1288_v60  ;;  %v3200_v60 = vld [vmem:[%s4042_s22 + $0x30] sm:$0xff]   ;;  %2994 = vmatprep.subr.bf16.mxu0 %v3649_v1 }
 0x594   : > { %v1404_v3 = vpop.xlane.xlu0 %1403 }
 0x595   : > { %3292 = vpow2.f32 %v1291_v2  ;;  %v1408_v4 = vsub.f32 %v1395_v39, %v1404_v3 }
 0x596   : > { %3294 = vpow2.f32 %v1412_v63  ;;  %2995 = vmatpush3.bf16.msra.mxu0 %v3200_v60  ;;  %v3201_v63 = vld [vmem:[%s4042_s22 + $0x38] sm:$0xff]   ;;  %s4572_s22 = sld [smem:[#allocation38_spill]] }
 0x597   : > { %v1410_v7 = vmul.f32 1.442695, %v1408_v4  ;;  %2996 = vmatprep.subr.bf16.mxu0 %v3649_v1 }
 0x599   : > { %3296 = vpow2.f32 %v1410_v7 }
 0x59a   : > { %3298 = vpow2.f32 %v1167_v5  ;;  %2997 = vmatpush3.bf16.msra.mxu0 %v3201_v63  ;;  %v3250_v63 = vld [vmem:[%s4118_s8 + $0x40] sm:$0xff]  }
 0x59b   : > { %v3291_v8 = vpop.eup %3290  ;;  %3300 = vpow2.f32 %v1169_v6  ;;  %2870 = vmatprep.subr.bf16.mxu0 %v3250_v63 }
 0x59c   : > { %v1293_v9 = vsel %vm1038_vm2, %v3291_v8, 0.0  ;;  %v3210_v49 = vld [vmem:[%s4572_s22 + $0x24] ss:$8 sps:$4 sm:$0xff]   ;;  %v3208_v50 = vld [vmem:[%s4572_s22 + $0x20] ss:$8 sps:$4 sm:$0xff]  }
 0x59d   : > { %1294 = vadd.xlane.f32.xlu0 %v1293_v9  ;;  %v3213_v51 = vld [vmem:[%s4572_s22 + $0x34] ss:$8 sps:$4 sm:$0xff]   ;;  %v3211_v52 = vld [vmem:[%s4572_s22 + $0x30] ss:$8 sps:$4 sm:$0xff]  }
 0x59e   : > { %v3219_v56 = vld [vmem:[%s4572_s22 + $0x54] ss:$8 sps:$4 sm:$0xff]  }
 0x59f   : > { %v3293_v10 = vpop.eup %3292  ;;  %v3225_v60 = vld [vmem:[%s4572_s22 + $0x74] ss:$8 sps:$4 sm:$0xff]  }
 0x5a0   : > { %v1296_v11 = vsel %vm1038_vm2, %v3293_v10, 0.0  ;;  %v3295_v12 = vpop.eup %3294 }
 0x5a1   : > { %1297 = vadd.xlane.f32.xlu1 %v1296_v11  ;;  %v1417_v16 = vsel %vm1038_vm2, %v3295_v12, 0.0 }
 0x5a3   : > { %v3297_v13 = vpop.eup %3296 }
 0x5a4   : > { %v3299_v14 = vpop.eup %3298  ;;  %v1414_v15 = vsel %vm1038_vm2, %v3297_v13, 0.0 }
 0x5a5   : > { %v3301_v17 = vpop.eup %3300  ;;  %1415 = vadd.xlane.f32.xlu0 %v1414_v15  ;;  %1418 = vadd.xlane.f32.xlu1 %v1417_v16  ;;  %v1171_v18 = vsel %vm1038_vm2, %v3299_v14, 0.0 }
 0x5a6   : > { %v1174_v19 = vsel %vm1038_vm2, %v3301_v17, 0.0 }
 0x5a9   : > { %1172 = vadd.xlane.f32.xlu0 %v1171_v18  ;;  %1175 = vadd.xlane.f32.xlu1 %v1174_v19 }
 0x5ba   : > { %1304 = vrot.lane.b32.xlu1 %v4184_v55, %s3653_s25 }
 0x5be   : > { %1425 = vrot.lane.b32.xlu1 %v4184_v55, %s3652_s18 }
 0x5bf   : > { %1183 = vrot.lane.b32.xlu0 %v4184_v55, %s3651_s10 }
 0x62a   : > { %v1295_v20 = vpop.xlane.xlu0 %1294 }
 0x62e   : > { %v1298_v21 = vpop.xlane.xlu1 %1297 }
 0x632   : > { %v1416_v22 = vpop.xlane.xlu0 %1415  ;;  %v1419_v23 = vpop.xlane.xlu1 %1418 }
 0x636   : > { %v1173_v25 = vpop.xlane.xlu0 %1172  ;;  %v1176_v26 = vpop.xlane.xlu1 %1175 }
 0x637   : > { %3302 = vrcp.f32 %v1173_v25 }
 0x638   : > { %3304 = vrcp.f32 %v1176_v26  ;;  %v2696_v26 = vld [vmem:[%s4573_s3] ss:$0 sm:$0xff] }
 0x639   : > { %3306 = vrcp.f32 %v1298_v21 }
 0x63a   : > { %v1184_v28 = vpop.permute.xlu0 %1183  ;;  %3308 = vrcp.f32 %v1295_v20  ;;  %v1305_v37 = vpop.permute.xlu1 %1304 }
 0x63b   : > { %2953 = vmatpush3.bf16.msra.mxu1 %v1184_v28  ;;  %3310 = vrcp.f32 %v1416_v22  ;;  %v722_v28 = vunpack.c.l.bf16 %v4155_v24 }
 0x63c   : > { %2964 = vmatprep.subr.bf16.mxu1 %v3649_v1  ;;  %3312 = vrcp.f32 %v1419_v23 }
 0x63e   : > { %v1426_v44 = vpop.permute.xlu1 %1425 }
 0x641   : > { %v3303_v30 = vpop.eup %3302 }
 0x642   : > { %v3305_v33 = vpop.eup %3304  ;;  %v1178_v34 = vmul.f32 %v3303_v30, %v3299_v14 }
 0x643   : > { %v1180_v35 = vmul.f32 %v3305_v33, %v3301_v17  ;;  %v3307_v36 = vpop.eup %3306 }
 0x644   : > { %v3309_v38 = vpop.eup %3308  ;;  %v1302_v39 = vmul.f32 %v3307_v36, %v3293_v10 }
 0x645   : > { %v1181_v55 = vpack.c.bf16 %v1180_v35, %v1178_v34  ;;  %v1300_v40 = vmul.f32 %v3309_v38, %v3291_v8  ;;  %v3311_v41 = vpop.eup %3310  ;;  %v3202_v38 = vld [vmem:[%s4572_s22] ss:$8 sps:$4 sm:$0xff]  }
 0x646   : > { %v3313_v43 = vpop.eup %3312  ;;  %v1421_v45 = vmul.f32 %v3311_v41, %v3297_v13  ;;  %v3205_v41 = vld [vmem:[%s4572_s22 + $0x10] ss:$8 sps:$4 sm:$0xff]  }
 0x647   : > { %2955 = vmatmul.mubr.msk.bf16.vlgmr.msra.gmra.mrb[16].mxu1 %vm1038_vm2, %v1181_v55  ;;  %v1303_v42 = vpack.c.bf16 %v1302_v39, %v1300_v40  ;;  %v1423_v46 = vmul.f32 %v3313_v43, %v3295_v12  ;;  %v3204_v39 = vld [vmem:[%s4572_s22 + $0x4] ss:$8 sps:$4 sm:$0xff]   ;;  %v3207_v40 = vld [vmem:[%s4572_s22 + $0x14] ss:$8 sps:$4 sm:$0xff]  }
 0x648   : > { %2965 = vmatpush3.bf16.msra.mxu1 %v1305_v37  ;;  %2966 = vmatprep.mubr.msk.bf16.mxu1 %vm3650_vm0, %v3649_v1 }
 0x649   : > { %2976 = vmatprep.subr.bf16.mxu1 %v3649_v1  ;;  %v1424_v47 = vpack.c.bf16 %v1423_v46, %v1421_v45 }
 0x64f   : > { %2967 = vmatmul.mubr.msk.bf16.vlgmr.msra.gmra.mrb[20].mxu1 %vm1038_vm2, %v1303_v42 }
 0x650   : > { %2977 = vmatpush3.bf16.msra.mxu1 %v1426_v44  ;;  %2978 = vmatprep.mubr.msk.bf16.mxu1 %vm3650_vm0, %v3649_v1 }
 0x651   : > { %1777 = vmatprep.subr.bf16.mxu1 %v3204_v39  ;;  %v3238_v39 = vld [vmem:[%s4572_s22 + $0xc0] ss:$8 sps:$4 sm:$0xff]  }
 0x657   : > { %2979 = vmatmul.mubr.msk.bf16.vlgmr.msra.gmra.mrb[24].mxu1 %vm1038_vm2, %v1424_v47 }
 0x658   : > { %1809 = vmatprep.mubr.bf16.mxu1 %v3648_v0  ;;  %1778 = vmatpush1.bf16.msra.mxu1 %v3202_v38  ;;  %v3240_v38 = vld [vmem:[%s4572_s22 + $0xc4] ss:$8 sps:$4 sm:$0xff]  }
 0x659   : > { %1779 = vmatprep.subr.bf16.mxu1 %v3207_v40  ;;  %v3241_v40 = vld [vmem:[%s4572_s22 + $0xd0] ss:$8 sps:$4 sm:$0xff]  }
 0x65c   : > { %1780 = vmatpush1.bf16.msra.mxu1 %v3205_v41  ;;  %v3246_v41 = vld [vmem:[%s4572_s22 + $0xe4] ss:$8 sps:$4 sm:$0xff]  }
 0x65d   : > { %1781 = vmatprep.subr.bf16.mxu1 %v3210_v49  ;;  %v1685_v49 = vld [vmem:[%s4086_s19] sm:$0x3] }
 0x660   : > { %1782 = vmatpush1.bf16.msra.mxu1 %v3208_v50  ;;  %v1690_v50 = vrot.slane %v1685_v49, %v4172_v29 }
 0x661   : > { %1783 = vmatprep.subr.bf16.mxu1 %v3213_v51  ;;  %v1694_v51 = vrot.slane %v1685_v49, %v4175_v31 }
 0x664   : > { %1784 = vmatpush1.bf16.msra.mxu1 %v3211_v52 }
 0x71a   : > { %v1223_v53 = vpop.f32.mrb[16].mxu1 }
 0x71b   : > { %v2956_v54 = vpop.f32.mrb[17].mxu1 }
 0x71c   : > { %v1226_v57 = vpop.f32.mrb[18].mxu1  ;;  %v3214_v54 = vld [vmem:[%s4572_s22 + $0x40] ss:$8 sps:$4 sm:$0xff]  }
 0x71d   : > { %v3147_v58 = vpack.i.bf16 %v1226_v57, %v1223_v53  ;;  %v2957_v59 = vpop.f32.mrb[19].mxu1  ;;  %v3216_v53 = vld [vmem:[%s4572_s22 + $0x44] ss:$8 sps:$4 sm:$0xff]   ;;  %v3217_v57 = vld [vmem:[%s4572_s22 + $0x50] ss:$8 sps:$4 sm:$0xff]  }
 0x71e   : > { %1785 = vmatprep.subr.bf16.mxu1 %v3216_v53  ;;  %v3220_v59 = vld [vmem:[%s4572_s22 + $0x60] ss:$8 sps:$4 sm:$0xff]  }
 0x71f   : > { %3148 = vrot.lane.b32.xlu1 %v3147_v58, %s3652_s18  ;;  %1786 = vmatpush1.bf16.msra.mxu1 %v3214_v54  ;;  %v3222_v58 = vld [vmem:[%s4572_s22 + $0x64] ss:$8 sps:$4 sm:$0xff]  }
 0x720   : > { %1787 = vmatprep.subr.bf16.mxu1 %v3219_v56 }
 0x722   : > { %v1344_v61 = vpop.f32.mrb[20].mxu1 }
 0x723   : > { %v2968_v62 = vpop.f32.mrb[21].mxu1  ;;  %1788 = vmatpush1.bf16.msra.mxu1 %v3217_v57 }
 0x724   : > { %v1347_v2 = vpop.f32.mrb[22].mxu1  ;;  %1789 = vmatprep.subr.bf16.mxu1 %v3222_v58  ;;  %v3228_v62 = vld [vmem:[%s4572_s22 + $0x84] ss:$8 sps:$4 sm:$0xff]  }
 0x725   : > { %v3152_v3 = vpack.i.bf16 %v1347_v2, %v1344_v61  ;;  %v2969_v4 = vpop.f32.mrb[23].mxu1  ;;  %v3223_v61 = vld [vmem:[%s4572_s22 + $0x70] ss:$8 sps:$4 sm:$0xff]  }
 0x726   : > { %v3251_v2 = vld [vmem:[%s4118_s8] sm:$0xff]   ;;  %v3253_v4 = vld [vmem:[%s4118_s8 + $0x8] sm:$0xff]  }
 0x727   : > { %3153 = vrot.lane.b32.xlu0 %v3152_v3, %s3653_s25  ;;  %1790 = vmatpush1.bf16.msra.mxu1 %v3220_v59  ;;  %v3252_v3 = vld [vmem:[%s4118_s8 + $0x48] sm:$0xff]  }
 0x728   : > { %1791 = vmatprep.subr.bf16.mxu1 %v3225_v60 }
 0x72a   : > { %v1465_v5 = vpop.f32.mrb[24].mxu1 }
 0x72b   : > { %v2980_v6 = vpop.f32.mrb[25].mxu1  ;;  %1792 = vmatpush1.bf16.msra.mxu1 %v3223_v61 }
 0x72c   : > { %v1468_v7 = vpop.f32.mrb[26].mxu1  ;;  %2107 = vmatprep.subr.bf16.mxu1 %v3228_v62  ;;  %v3255_v6 = vld [vmem:[%s4118_s8 + $0x10] sm:$0xff]  }
 0x72d   : > { %v3157_v8 = vpack.i.bf16 %v1468_v7, %v1465_v5  ;;  %v2981_v9 = vpop.f32.mrb[27].mxu1  ;;  %v3254_v5 = vld [vmem:[%s4118_s8 + $0x50] sm:$0xff]   ;;  %v3256_v7 = vld [vmem:[%s4118_s8 + $0x58] sm:$0xff]  }
 0x72e   : > { %v3258_v9 = vld [vmem:[%s4118_s8 + $0x60] sm:$0xff]  }
 0x72f   : > { %3158 = vrot.lane.b32.xlu1 %v3157_v8, %s3651_s10  ;;  %v3257_v8 = vld [vmem:[%s4118_s8 + $0x18] sm:$0xff]  }
 0x791   : > { %v3149_v10 = vpop.permute.xlu1 %3148 }
 0x792   : > { %v3151_v12 = vunpack.i.h.bf16 %v3149_v10  ;;  %v3150_v13 = vunpack.i.l.bf16 %v3149_v10  ;;  %v3259_v10 = vld [vmem:[%s4118_s8 + $0x20] sm:$0xff]  }
 0x794   : > { %v1497_v16 = vsel %vm990_vm1, %v4218_v32, %v3151_v12  ;;  %v1496_v17 = vsel %vm990_vm1, %v4216_v27, %v3150_v13  ;;  %v723_v27 = vunpack.c.h.bf16 %v4155_v24  ;;  %v3261_v12 = vld [vmem:[%s4118_s8 + $0x28] sm:$0xff]  }
 0x799   : > { %v3154_v11 = vpop.permute.xlu0 %3153 }
 0x79a   : > { %v3156_v1 = vunpack.i.h.bf16 %v3154_v11  ;;  %v3155_v14 = vunpack.i.l.bf16 %v3154_v11  ;;  %v3260_v11 = vld [vmem:[%s4118_s8 + $0x68] sm:$0xff]  }
 0x79c   : > { %v1500_v20 = vsel %vm1498_vm3, %v1497_v16, %v3156_v1  ;;  %v1499_v21 = vsel %vm1498_vm3, %v1496_v17, %v3155_v14 }
 0x7a1   : > { %v3159_v15 = vpop.permute.xlu1 %3158 }
 0x7a2   : > { %v3161_v18 = vunpack.i.h.bf16 %v3159_v15  ;;  %v3160_v19 = vunpack.i.l.bf16 %v3159_v15 }
 0x7a4   : > { %v1503_v22 = vsel %vm1501_vm4, %v1500_v20, %v3161_v18  ;;  %v1502_v23 = vsel %vm1501_vm4, %v1499_v21, %v3160_v19  ;;  %v2705_v20 = vld [vmem:[%s4575_s17] ss:$0 sm:$0xff] }
 0x7a5   : > { %v1504_v25 = vpack.c.bf16 %v1503_v22, %v1502_v23 }
 0x7a7   : > { %2999 = vmatmul.mubr.bf16.vlgmr.msra.gmra.mrb[12].mxu0 %v1504_v25  ;;  %v2706_v25 = vld [vmem:[%s4577_s4] ss:$0 sm:$0xff] }
 0x7a8   : > { %2871 = vmatpush3.bf16.msra.mxu0 %v3251_v2 }
 0x7a9   : > { %2872 = vmatprep.subr.bf16.mxu0 %v3252_v3 }
 0x7ac   : > { %2873 = vmatpush3.bf16.msra.mxu0 %v3253_v4 }
 0x7ad   : > { %2874 = vmatprep.subr.bf16.mxu0 %v3254_v5  ;;  %v3267_v5 = vld [vmem:[%s4118_s8 + $0x80] sm:$0xff]  }
 0x7b0   : > { %2875 = vmatpush3.bf16.msra.mxu0 %v3255_v6  ;;  %v3268_v6 = vld [vmem:[%s4118_s8 + $0xc8] sm:$0xff]  }
 0x7b1   : > { %2876 = vmatprep.subr.bf16.mxu0 %v3256_v7  ;;  %v3269_v7 = vld [vmem:[%s4118_s8 + $0x88] sm:$0xff]  }
 0x7b4   : > { %2877 = vmatpush3.bf16.msra.mxu0 %v3257_v8  ;;  %v3270_v8 = vld [vmem:[%s4118_s8 + $0xd0] sm:$0xff]  }
 0x7b5   : > { %2878 = vmatprep.subr.bf16.mxu0 %v3258_v9  ;;  %v3271_v9 = vld [vmem:[%s4118_s8 + $0x90] sm:$0xff]  }
 0x7b8   : > { %2879 = vmatpush3.bf16.msra.mxu0 %v3259_v10  ;;  %v3272_v10 = vld [vmem:[%s4118_s8 + $0xd8] sm:$0xff]  }
 0x7b9   : > { %2880 = vmatprep.subr.bf16.mxu0 %v3260_v11  ;;  %v3273_v11 = vld [vmem:[%s4118_s8 + $0x98] sm:$0xff]  }
 0x7bc   : > { %2881 = vmatpush3.bf16.msra.mxu0 %v3261_v12  ;;  %v3274_v12 = vld [vmem:[%s4118_s8 + $0xe0] sm:$0xff]  }
 0x87a   : > { %v1610_v30 = vpop.f32.mrb[12].mxu0 }
 0x87b   : > { %v1611_v32 = vadd.f32 %v2696_v26, %v1610_v30  ;;  %v3000_v33 = vpop.f32.mrb[13].mxu0 }
 0x87c   : > { %v1613_v34 = vpop.f32.mrb[14].mxu0 }
 0x87d   : > { %v1614_v35 = vadd.f32 %v2696_v26, %v1613_v34  ;;  %v3001_v55 = vpop.f32.mrb[15].mxu0  ;;  %v1617_v36 = vadd.f32 %v1611_v32, %v722_v28  ;;  %v3226_v32 = vld [vmem:[%s4572_s22 + $0x80] ss:$8 sps:$4 sm:$0xff]   ;;  %v3229_v34 = vld [vmem:[%s4572_s22 + $0x90] ss:$8 sps:$4 sm:$0xff]  }
 0x87e   : > { %v3232_v55 = vld [vmem:[%s4572_s22 + $0xa0] ss:$8 sps:$4 sm:$0xff]  }
 0x87f   : > { %1621 = vadd.xlane.f32.xlu0 %v1617_v36  ;;  %v1618_v37 = vadd.f32 %v1614_v35, %v723_v27  ;;  %v3231_v27 = vld [vmem:[%s4572_s22 + $0x94] ss:$8 sps:$4 sm:$0xff]   ;;  %v3234_v35 = vld [vmem:[%s4572_s22 + $0xa4] ss:$8 sps:$4 sm:$0xff]  }
 0x881   : > { %1623 = vadd.xlane.f32.xlu1 %v1618_v37 }
 0x90c   : > { %v1622_v24 = vpop.xlane.xlu0 %1621 }
 0x90d   : > { %v1626_v42 = vmul.f32 0.0078125, %v1622_v24  ;;  %v3244_v24 = vld [vmem:[%s4572_s22 + $0xe0] ss:$8 sps:$4 sm:$0xff]  }
 0x90e   : > { %v1624_v43 = vpop.xlane.xlu1 %1623 }
 0x90f   : > { %v4278_v44 = vsub.f32 %v1617_v36, %v1626_v42  ;;  %v1627_v45 = vmul.f32 0.0078125, %v1624_v43  ;;  %v3237_v36 = vld [vmem:[%s4572_s22 + $0xb4] ss:$8 sps:$4 sm:$0xff]   ;;  %v3247_v43 = vld [vmem:[%s4572_s22 + $0xf0] ss:$8 sps:$4 sm:$0xff]  }
 0x910   : > { %v3249_v42 = vld [vmem:[%s4572_s22 + $0xf4] ss:$8 sps:$4 sm:$0xff]  }
 0x911   : > { %v4280_v46 = vsub.f32 %v1618_v37, %v1627_v45  ;;  %v1630_v47 = vmul.f32 %v4278_v44, %v4278_v44  ;;  %v3235_v37 = vld [vmem:[%s4572_s22 + $0xb0] ss:$8 sps:$4 sm:$0xff]  }
 0x912   : > { %v3263_v45 = vld [vmem:[%s4118_s8 + $0x30] sm:$0xff]  }
 0x913   : > { %1632 = vadd.xlane.f32.xlu0 %v1630_v47  ;;  %v1631_v48 = vmul.f32 %v4280_v46, %v4280_v46  ;;  %v3265_v47 = vld [vmem:[%s4118_s8 + $0x38] sm:$0xff]  }
 0x917   : > { %1634 = vadd.xlane.f32.xlu0 %v1631_v48  ;;  %v3266_v48 = vld [vmem:[%s4118_s8 + $0xc0] sm:$0xff]  }
 0x9a0   : > { %v1633_v13 = vpop.xlane.xlu0 %1632 }
 0x9a1   : > { %v1636_v1 = vmul.f32 0.0078125, %v1633_v13  ;;  %v3275_v13 = vld [vmem:[%s4118_s8 + $0xa0] sm:$0xff]  }
 0x9a3   : > { %v1638_v14 = vadd.f32 1e-05, %v1636_v1  ;;  %v3276_v1 = vld [vmem:[%s4118_s8 + $0xe8] sm:$0xff]  }
 0x9a4   : > { %v1635_v15 = vpop.xlane.xlu0 %1634 }
 0x9a5   : > { %3314 = vrsqrt.f32 %v1638_v14  ;;  %v1637_v16 = vmul.f32 0.0078125, %v1635_v15  ;;  %v2756_v14 = vld [vmem:[%s4086_s19 + $0x2] sm:$0x3]  ;;  %v3277_v15 = vld [vmem:[%s4118_s8 + $0xa8] sm:$0xff]  }
 0x9a7   : > { %v1639_v17 = vadd.f32 1e-05, %v1637_v16  ;;  %v2020_v16 = vrot.slane %v2756_v14, %v4172_v29 }
 0x9a9   : > { %3316 = vrsqrt.f32 %v1639_v17  ;;  %v3278_v17 = vld [vmem:[%s4118_s8 + $0xf0] sm:$0xff]  }
 0x9af   : > { %v3315_v18 = vpop.eup %3314 }
 0x9b0   : > { %v1642_v19 = vmul.f32 %v3315_v18, %v4278_v44  ;;  %v3262_v44 = vld [vmem:[%s4118_s8 + $0x70] sm:$0xff]   ;;  %v2024_v18 = vrot.slane %v2756_v14, %v4175_v31 }
 0x9b1   : > { %2882 = vmatprep.subr.bf16.mxu0 %v3262_v44 }
 0x9b2   : > { %v1650_v23 = vmul.f32 %v2705_v20, %v1642_v19  ;;  %2883 = vmatpush3.bf16.msra.mxu0 %v3263_v45 }
 0x9b3   : > { %v3317_v21 = vpop.eup %3316 }
 0x9b4   : > { %v1643_v22 = vmul.f32 %v3317_v21, %v4280_v46  ;;  %v4323_v28 = vadd.f32 %v2706_v25, %v1650_v23  ;;  %v3264_v46 = vld [vmem:[%s4118_s8 + $0x78] sm:$0xff]  }
 0x9b5   : > { %2884 = vmatprep.subr.bf16.mxu0 %v3264_v46  ;;  %v3280_v23 = vld [vmem:[%s4118_s8 + $0xf8] sm:$0xff]  }
 0x9b6   : > { %v1651_v26 = vmul.f32 %v2705_v20, %v1643_v22  ;;  %2885 = vmatpush3.bf16.msra.mxu0 %v3265_v47  ;;  %v3279_v20 = vld [vmem:[%s4118_s8 + $0xb0] sm:$0xff]  }
 0x9b7   : > { %2892 = vmatprep.subr.bf16.mxu0 %v3266_v48 }
 0x9b8   : > { %v4325_v30 = vadd.f32 %v2706_v25, %v1651_v26 }
 0x9ba   : > { %v1660_v33 = vpack.c.bf16 %v4325_v30, %v4323_v28 }
 0x9bc   : > { %1810 = vmatmul.mubr.bf16.vlgmr.msra.gmra.mrb[28].mxu1 %v1660_v33 }
 0x9bd   : > { %2108 = vmatpush1.bf16.msra.mxu1 %v3226_v32  ;;  %2139 = vmatprep.mubr.bf16.mxu1 %v3648_v0  ;;  %v3243_v0 = vld [vmem:[%s4572_s22 + $0xd4] ss:$8 sps:$4 sm:$0xff]  }
 0x9be   : > { %2109 = vmatprep.subr.bf16.mxu1 %v3231_v27 }
 0x9c1   : > { %2110 = vmatpush1.bf16.msra.mxu1 %v3229_v34  ;;  %v3281_v34 = vld [vmem:[%s4118_s8 + $0xb8] sm:$0xff]  }
 0x9c2   : > { %2111 = vmatprep.subr.bf16.mxu1 %v3234_v35 }
 0x9c5   : > { %2112 = vmatpush1.bf16.msra.mxu1 %v3232_v55 }
 0x9c6   : > { %2113 = vmatprep.subr.bf16.mxu1 %v3237_v36 }
 0x9c9   : > { %2114 = vmatpush1.bf16.msra.mxu1 %v3235_v37 }
 0x9ca   : > { %2115 = vmatprep.subr.bf16.mxu1 %v3240_v38 }
 0x9cd   : > { %2116 = vmatpush1.bf16.msra.mxu1 %v3238_v39 }
 0x9ce   : > { %2117 = vmatprep.subr.bf16.mxu1 %v3243_v0 }
 0x9d1   : > { %2118 = vmatpush1.bf16.msra.mxu1 %v3241_v40 }
 0x9d2   : > { %2119 = vmatprep.subr.bf16.mxu1 %v3246_v41 }
 0x9d5   : > { %2120 = vmatpush1.bf16.msra.mxu1 %v3244_v24 }
 0x9d6   : > { %2121 = vmatprep.subr.bf16.mxu1 %v3249_v42  ;;  %v2707_v42 = vld [vmem:[%s690_s6] ss:$0 sm:$0xff] }
 0x9d9   : > { %2122 = vmatpush1.bf16.msra.mxu1 %v3247_v43 }
 0x9dc   : > { %2140 = vmatmul.mubr.bf16.vlgmr.msra.gmra.mrb[32].mxu1 %v1660_v33 }
 0xa8f   : > { %v1811_v52 = vpop.f32.mrb[28].mxu1 }
 0xa90   : > { %v1812_v53 = vadd.f32 %v1811_v52, %v1690_v50  ;;  %v1813_v54 = vpop.f32.mrb[29].mxu1 }
 0xa91   : > { %v1814_v56 = vadd.f32 %v1813_v54, %v1694_v51  ;;  %v1815_v57 = vpop.f32.mrb[30].mxu1 }
 0xa92   : > { %v1816_v58 = vadd.f32 %v1815_v57, %v1690_v50  ;;  %v1817_v59 = vpop.f32.mrb[31].mxu1  ;;  %v1820_v61 = vmax.f32 %v1812_v53, 0.0 }
 0xa93   : > { %v1818_v60 = vadd.f32 %v1817_v59, %v1694_v51  ;;  %v1821_v63 = vmax.f32 %v1814_v56, 0.0 }
 0xa94   : > { %v1822_v62 = vmax.f32 %v1816_v58, 0.0 }
 0xa95   : > { %v1823_v2 = vmax.f32 %v1818_v60, 0.0 }
 0xa96   : > { %v1824_v3 = vpack.c.bf16 %v1822_v62, %v1820_v61 }
 0xa97   : > { %v1825_v4 = vpack.c.bf16 %v1823_v2, %v1821_v63 }
 0xa99   : > { %1986 = vmatprep.mubr.bf16.mxu0 %v1825_v4 }
 0xa9a   : > { %1987 = vmatmul.mubr.bf16.vlgmr.msra.gmra.mrb[16].mxu0 %v1824_v3 }
 0xa9b   : > { %2893 = vmatpush3.bf16.msra.mxu0 %v3267_v5 }
 0xa9c   : > { %2894 = vmatprep.subr.bf16.mxu0 %v3268_v6 }
 0xa9f   : > { %2895 = vmatpush3.bf16.msra.mxu0 %v3269_v7  ;;  %v2821_v7 = vld [vmem:[%s693_s12] ss:$0 sm:$0xff] }
 0xaa0   : > { %2896 = vmatprep.subr.bf16.mxu0 %v3270_v8 }
 0xaa3   : > { %2897 = vmatpush3.bf16.msra.mxu0 %v3271_v9 }
 0xaa4   : > { %2898 = vmatprep.subr.bf16.mxu0 %v3272_v10  ;;  %v2822_v10 = vld [vmem:[%s696_s5] ss:$0 sm:$0xff] }
 0xaa7   : > { %2899 = vmatpush3.bf16.msra.mxu0 %v3273_v11 }
 0xaa8   : > { %2900 = vmatprep.subr.bf16.mxu0 %v3274_v12 }
 0xaab   : > { %2901 = vmatpush3.bf16.msra.mxu0 %v3275_v13 }
 0xaac   : > { %2902 = vmatprep.subr.bf16.mxu0 %v3276_v1 }
 0xaaf   : > { %v2141_v19 = vpop.f32.mrb[32].mxu1  ;;  %2903 = vmatpush3.bf16.msra.mxu0 %v3277_v15 }
 0xab0   : > { %v2142_v21 = vadd.f32 %v2141_v19, %v2020_v16  ;;  %v2143_v22 = vpop.f32.mrb[33].mxu1  ;;  %2904 = vmatprep.subr.bf16.mxu0 %v3278_v17 }
 0xab1   : > { %v2144_v25 = vadd.f32 %v2143_v22, %v2024_v18  ;;  %v2145_v26 = vpop.f32.mrb[34].mxu1 }
 0xab2   : > { %v2146_v32 = vadd.f32 %v2145_v26, %v2020_v16  ;;  %v2147_v33 = vpop.f32.mrb[35].mxu1  ;;  %v2150_v35 = vmax.f32 %v2142_v21, 0.0 }
 0xab3   : > { %v2148_v27 = vadd.f32 %v2147_v33, %v2024_v18  ;;  %2905 = vmatpush3.bf16.msra.mxu0 %v3279_v20  ;;  %v2151_v55 = vmax.f32 %v2144_v25, 0.0 }
 0xab4   : > { %v2152_v29 = vmax.f32 %v2146_v32, 0.0  ;;  %2906 = vmatprep.subr.bf16.mxu0 %v3280_v23 }
 0xab5   : > { %v2153_v31 = vmax.f32 %v2148_v27, 0.0 }
 0xab6   : > { %v2154_v36 = vpack.c.bf16 %v2152_v29, %v2150_v35 }
 0xab7   : > { %v2155_v37 = vpack.c.bf16 %v2153_v31, %v2151_v55  ;;  %2907 = vmatpush3.bf16.msra.mxu0 %v3281_v34 }
 0xab9   : > { %2317 = vmatprep.mubr.bf16.mxu0 %v2155_v37 }
 0xaba   : > { %2318 = vmatmul.mubr.bf16.vlgmr.msra.gmra.mrb[20].mxu0 %v2154_v36 }
 0xb6d   : > { %v2886_v38 = vpop.f32.mrb[16].mxu0 }
 0xb6e   : > { %v2887_v39 = vpop.f32.mrb[17].mxu0 }
 0xb6f   : > { %v2888_v0 = vadd.f32 %v2887_v39, %v2886_v38  ;;  %v2889_v40 = vpop.f32.mrb[18].mxu0 }
 0xb70   : > { %v2890_v41 = vpop.f32.mrb[19].mxu0 }
 0xb71   : > { %v2891_v24 = vadd.f32 %v2890_v41, %v2889_v40  ;;  %v1995_v45 = vadd.f32 %v2888_v0, %v2707_v42 }
 0xb73   : > { %v1996_v49 = vadd.f32 %v2891_v24, %v2707_v42 }
 0xb8d   : > { %v2908_v43 = vpop.f32.mrb[20].mxu0 }
 0xb8e   : > { %v2909_v44 = vpop.f32.mrb[21].mxu0 }
 0xb8f   : > { %v2910_v46 = vadd.f32 %v2909_v44, %v2908_v43  ;;  %v2911_v47 = vpop.f32.mrb[22].mxu0 }
 0xb90   : > { %v2912_v48 = vpop.f32.mrb[23].mxu0 }
 0xb91   : > { %v2326_v50 = vadd.f32 %v2910_v46, %v1995_v45  ;;  %v2913_v51 = vadd.f32 %v2912_v48, %v2911_v47 }
 0xb93   : > { %v2327_v52 = vadd.f32 %v2913_v51, %v1996_v49  ;;  %v2328_v53 = vadd.f32 %v2326_v50, %v4323_v28 }
 0xb95   : > { %2332 = vadd.xlane.f32.xlu0 %v2328_v53  ;;  %v2329_v54 = vadd.f32 %v2327_v52, %v4325_v30 }
 0xb97   : > { %2334 = vadd.xlane.f32.xlu1 %v2329_v54 }
 0xc22   : > { %v2333_v56 = vpop.xlane.xlu0 %2332 }
 0xc23   : > { %v2336_v57 = vmul.f32 0.0078125, %v2333_v56 }
 0xc24   : > { %v2335_v58 = vpop.xlane.xlu1 %2334 }
 0xc25   : > { %v2338_v59 = vsub.f32 %v2328_v53, %v2336_v57  ;;  %v2337_v60 = vmul.f32 0.0078125, %v2335_v58 }
 0xc27   : > { %v2339_v61 = vsub.f32 %v2329_v54, %v2337_v60  ;;  %v2340_v62 = vmul.f32 %v2338_v59, %v2338_v59 }
 0xc29   : > { %2342 = vadd.xlane.f32.xlu0 %v2340_v62  ;;  %v2341_v63 = vmul.f32 %v2339_v61, %v2339_v61 }
 0xc2b   : > { %2344 = vadd.xlane.f32.xlu1 %v2341_v63 }
 0xcb6   : > { %v2343_v2 = vpop.xlane.xlu0 %2342 }
 0xcb7   : > { %v2346_v3 = vmul.f32 0.0078125, %v2343_v2 }
 0xcb8   : > { %v2345_v4 = vpop.xlane.xlu1 %2344 }
 0xcb9   : > { %v2348_v28 = vadd.f32 1e-05, %v2346_v3  ;;  %v2347_v5 = vmul.f32 0.0078125, %v2345_v4 }
 0xcbb   : > { %3318 = vrsqrt.f32 %v2348_v28  ;;  %v2349_v30 = vadd.f32 1e-05, %v2347_v5 }
 0xcbd   : > { %3320 = vrsqrt.f32 %v2349_v30 }
 0xcc5   : > { %v3319_v6 = vpop.eup %3318 }
 0xcc6   : > { %v2352_v8 = vmul.f32 %v3319_v6, %v2338_v59  ;;  %2373 = sbr.rel (%p2823_p2) target bundleno = 3281 (0xcd1), region = 100 }
 0xcc7   : > { %v3321_v9 = vpop.eup %3320 }
 0xcc8   : > { %v2360_v11 = vmul.f32 %v2821_v7, %v2352_v8  ;;  %v2353_v12 = vmul.f32 %v3321_v9, %v2339_v61 }
 0xcca   : > { %v2368_v13 = vadd.f32 %v2822_v10, %v2360_v11  ;;  %v2361_v1 = vmul.f32 %v2821_v7, %v2353_v12 }
 0xccc   : > { %v2369_v14 = vadd.f32 %v2822_v10, %v2361_v1 }
 0xcce   : > { %v2374_v15 = vpack.c.bf16 %v2369_v14, %v2368_v13 }
 0xcd0   : > { %2375 = vst [vmem:[#allocation2] sm:$0xff] %v2374_v15 }
 0xcd1 PF: > { %p2824_p10 = scmp.ne.s32.totalorder %s3618_s14, 1 }
 0xcd2   : > { %2380 = vst [vmem:[%s4121_s11] sm:$0xff] (!%p2824_p10), %v2368_v13  ;;  %2381 = vst [vmem:[%s4121_s11 + $0x8] sm:$0xff] (!%p2824_p10), %v2369_v14 }
 0xcd3   : > { %2379 = sbr.rel (%p2824_p10) target bundleno = 3290 (0xcda), region = 104 }
 0xcda PF: > { %s4578_s5 = sld [smem:[#allocation28_spill]]  ;;  %s4579_s27 = sld [smem:[#allocation24_spill]] }
 0xcdb   : > { %s4580_s12 = sld [smem:[#allocation36_spill]]  ;;  %s4581_s10 = sld [smem:[#allocation52_spill]] }
 0xcdc   : > { %s2396_s25 = sshll.u32 %s4121_s11, 4  ;;  %s3654_s24 = smov [#allocation13]   ;;  %s4399_s25 = int_to_ptr.vmem [resolvable:$true] %s2396_s25 }
 0xcdd   : > { %s3500_s3 = scalar_lea.vmem %s4399_s25, 256  ;;  %s3504_s15 = sshll.u32 %s3654_s24, 4  ;;  %s3505_s15 = int_to_ptr.vmem [resolvable:$false] %s3504_s15 }
 0xcde   : > { %p3501_p11 = scmp.ne.s32.totalorder %s4399_s25, %s3500_s3  ;;  %s3506_s30 = scalar_lea.vmem %s3505_s15, 512 }
 0xcdf   : > { %p3507_p4 = scmp.lt.s32.totalorder %s4399_s25, %s3505_s15  ;;  %p3508_p1 = scmp.lt.s32.totalorder %s3506_s30, %s3500_s3 }
 0xce0   : > { %s2835_s26 = sshll.u32 %s4578_s5, 8  ;;  %s4582_s14 = sand.u32 1, %s4579_s27  }
 0xce1   : > { %s4396_s18 = scalar_lea.hbm %s4581_s10, %s2835_s26  ;;  %s4403_s22 = scalar_lea.sflag [#allocation6], %s4582_s14 }
 0xce2   : > { %p4583_p3 = scmp.ne.s32.totalorder %s4580_s12, 0  ;;  %p3509_p6 = por %p3508_p1, %p3507_p4 }
 0xce4   : > { %p3502_p8 = pnand %p3501_p11, %p4583_p3 }
 0xce6   : > { %p3503_p9 = pneg %p3502_p8 }
 0xce8   : > { %p3510_p0 = pnand %p3509_p6, %p3503_p9 }
 0xcea   : > { %3513 = shalt.err (!%p3510_p0)
}
 0xceb   : > { %s3514_s11 = scalar_lea.hbm %s4396_s18, 256  ;;  %s3518_s1 = scalar_lea.hbm %s4581_s10, 512 }
 0xcec   : > { %p3515_p12 = scmp.ne.s32.totalorder %s4396_s18, %s3514_s11  ;;  %p3519_p5 = scmp.lt.u32.totalorder %s4396_s18, %s4581_s10 }
 0xced   : > { %p3520_p2 = scmp.lt.u32.totalorder %s3518_s1, %s3514_s11  ;;  %p3522_p11 = scmp.lt.u32.totalorder %s3514_s11, %s4396_s18 }
 0xcee   : > { %p3516_p13 = pnand %p3515_p12, %p4583_p3 }
 0xcef   : > { %p3521_p10 = por %p3520_p2, %p3519_p5 }
 0xcf0   : > { %p3517_p7 = pneg %p3516_p13 }
 0xcf1   : > { %p3523_p8 = por %p3522_p11, %p3521_p10 }
 0xcf3   : > { %p3524_p9 = pnand %p3523_p8, %p3517_p7 }
 0xcf5   : > { %3527 = shalt.err (!%p3524_p9)
}
 0xcf6   : > { %s3655_s19 = smov 128   ;;  %s3656_s9 = smov 8  }
 0xcf7   : > { %3019 = dma.vmem_to_hbm [thread:$0]  (%p4583_p3), %s4399_s25, 256, %s4396_s18, %s4403_s22, %s3655_s19, %s3655_s19, %s3656_s9  }
 0xcf8 PF: > { %s4584_s6 = sld [smem:[#allocation31_spill]]  ;;  %s4585_s29 = sld [smem:[#allocation23_spill]] }
 0xcf9   : > { %s4586_s16 = sld [smem:[#allocation37_spill]] }
 0xcfe   : > { %p3043_p4 = scmp.ge.s32.totalorder %s4584_s6, 2  ;;  %s2411_s20 = sand.u32 1, %s4585_s29  }
 0xcff   : > { %p4587_p1 = scmp.ne.s32.totalorder %s4586_s16, 0  ;;  %s2412_s5 = scalar_lea.sflag [#allocation6], %s2411_s20 }
 0xd01   : > { %p3038_p6 = pnand %p3043_p4, %p4587_p1 }
 0xd03   : > { %3589 = dma.done.wait (!%p3038_p6), %s2412_s5, 256  }
 0xd04   : > { %3591 = vsyncadd (!%p3038_p6), %s2412_s5, 4294967040  ;;  %s35_s18 = sadd.s32 1, %s4584_s6   ;;  %s4588_s25 = sld [smem:[#allocation24_spill]] }
 0xd05   : > { %p32_p0 = scmp.ge.s32.totalorder %s35_s18, 6   ;;  %s4589_s26 = sld [smem:[#allocation25_spill]] }
 0xd06   : > { %s4590_s27 = sld [smem:[#allocation35_spill]]  ;;  %s4591_s28 = sld [smem:[#allocation26_spill]] }
 0xd07   : > { %s4592_s29 = sld [smem:[#allocation27_spill]]  ;;  %s4593_s30 = sld [smem:[#allocation34_spill]] }
 0xd08   : > { %s4594_s14 = sld [smem:[#allocation29_spill]]  ;;  %s4595_s15 = sld [smem:[#allocation30_spill]] }
 0xd09   : > { %s4596_s16 = sld [smem:[#allocation32_spill]]  ;;  %s4597_s17 = sld [smem:[#allocation33_spill]] }
 0xd0a   :  { %34 = sbr.rel (!%p32_p0) target bundleno = 28 (0x1c), region = 202 }
 0xd11   :  { %2417 = vsyncpa [#allocation5], 1 }
 0xd12   :  { %2419 = vsyncpa [#allocation5 + $0x1], 1 }
 0xd13   :  { %2420 = vsyncpa [#allocation8], 1 }
 0xd14   :  { %2422 = vsyncpa [#allocation8 + $0x1], 1 }
 0xd15   :  { %2423 = vsyncpa [#allocation11], 1 }
 0xd16   :  { %2425 = vsyncpa [#allocation11 + $0x1], 1 }
 0xd17   :  { %2426 = vsyncpa [#allocation6], 1 }
 0xd18   :  { %2428 = vsyncpa [#allocation6 + $0x1], 1 }
 0xd19   :  { %2429 = vsyncmov [#allocation3] }
 0xd1c   :  { %s2430_s12 = vpop.sfrf %2429 }
 0xd1d   :  { %p2830_p3 = scmp.ne.s32.totalorder %s2430_s12, 0 }
 0xd1f   :  { %2434 = shalt.err (%p2830_p3)  }

</bundles_post_ra>
